<compile_context>
chip_gen: v5e
topology: v5e:2x2
jax: 0.10.0
libtpu: 0.0.40
codegen_flags: <defaults>
</compile_context>

<pallas_src>
import math

import jax
import jax.numpy as jnp
from jax.experimental import pallas as pl
from jax.experimental.pallas import tpu as pltpu


# ----------------------------------------------------------------------------
# VMEM sizing helpers
# ----------------------------------------------------------------------------
def _vmem_capacity_bytes():
    try:
        return int(pltpu.get_tpu_info().vmem_capacity_bytes)
    except Exception:
        return 64 * 1024 * 1024  # conservative fallback (v7x per-core VMEM)


_VMEM_BYTES = _vmem_capacity_bytes()
_VMEM_LIMIT = int(_VMEM_BYTES * 3) // 4  # leave headroom for compiler scratch


def _round_up(x, m):
    return ((x + m - 1) // m) * m


def _choose_law_tile(l, r, d, s):
    """Largest law tile whose live VMEM (tile + temporaries + dbl-buffered K/V)
    stays within ~half of VMEM.  -> tl~8 on v5e/v6e (128 MiB), ~2-4 on v7x."""
    budget = _VMEM_BYTES // 2
    for tl in (16, 8, 4, 2, 1):
        if tl > l:
            continue
        rows = tl * r
        live = (2 * rows * d * 2          # bf16 laws_q tile, double-buffered
                + 2 * rows * s * 4        # f32 scores + probs
                + rows * s * 2            # bf16 probs copy for the PV matmul
                + rows * d * 4            # f32 attention output
                + 2 * 2 * s * (2 * d) * 2)  # double-buffered bf16 fused K/V block
        if live <= budget:
            return tl
    return 1


# ----------------------------------------------------------------------------
# Kernel 1: row-tiled linear  y = x @ W + b  (bf16 MXU operands, f32 accumulate)
# ----------------------------------------------------------------------------
def _linear_kernel(x_ref, w_ref, b_ref, o_ref):
    acc = (
        jnp.dot(
            x_ref[...].astype(jnp.bfloat16),
            w_ref[...].astype(jnp.bfloat16),
            preferred_element_type=jnp.float32,
        )
        + b_ref[...]
    )
    o_ref[...] = acc.astype(o_ref.dtype)


def pallas_linear(x2d, w, b, *, block_rows=512, out_dtype=jnp.float32):
    """x2d: (N, Din), w: (Din, Dout), b: (1, Dout) -> (N, Dout) in out_dtype."""
    n, din = x2d.shape
    dout = w.shape[1]
    tn = min(block_rows, _round_up(n, 8))
    n_pad = _round_up(n, tn)
    if n_pad != n:
        x2d = jnp.pad(x2d, ((0, n_pad - n), (0, 0)))
    out = pl.pallas_call(
        _linear_kernel,
        out_shape=jax.ShapeDtypeStruct((n_pad, dout), out_dtype),
        grid_spec=pltpu.PrefetchScalarGridSpec(
            num_scalar_prefetch=0,
            grid=(n_pad // tn,),
            in_specs=[
                pl.BlockSpec((tn, din), lambda i: (i, 0)),
                pl.BlockSpec((din, dout), lambda i: (0, 0)),
                pl.BlockSpec((1, dout), lambda i: (0, 0)),
            ],
            out_specs=pl.BlockSpec((tn, dout), lambda i: (i, 0)),
        ),
        compiler_params=pltpu.CompilerParams(
            dimension_semantics=("parallel",),
            vmem_limit_bytes=_VMEM_LIMIT,
        ),
    )(x2d, w, b)
    return out[:n] if n_pad != n else out


# ----------------------------------------------------------------------------
# Kernel 2: law->fact cross attention + per-token head projections + per-law
# reduction.  Grid = (law-tile lt [outer], fact f [inner]) so the laws_q tile
# stays resident across facts.  Per (lt, f) block it writes a (3, tl) slab:
#   row 0: law1(tanh(law_d(g)))   (final law logit)
#   row 1: accu1(tanh(accu_d(g))) (pre-tanh, pre-accu2)
#   row 2: term1(tanh(term_d(g))) (pre-tanh, pre-term2)
# ----------------------------------------------------------------------------
def _law_cross_attn_kernel(
    lawsq_ref, kv_ref, mask_ref, wd_ref, bd_ref, w1_ref, b1_ref, out_ref
):
    tl, r, d = lawsq_ref.shape
    lq = lawsq_ref[...].reshape(tl * r, d)          # (TL*R, D) bf16, pre-scaled
    kv = kv_ref[0]                                  # (S, 2D)  bf16
    k = kv[:, :d]                                   # (S, D)
    v = kv[:, d:]                                   # (S, D)
    neg_bias = (1.0 - mask_ref[0]) * -10000.0       # (1, S) f32

    # scores = einsum('nd,sd->ns'); 1/sqrt(D) already folded into law_q weights.
    scores = jax.lax.dot_general(
        lq, k, (((1,), (1,)), ((), ())), preferred_element_type=jnp.float32
    )
    scores = scores + neg_bias                      # broadcast over rows

    # softmax over the fact-sequence axis (f32; reciprocal on the EUP)
    m = jnp.max(scores, axis=-1, keepdims=True)
    e = jnp.exp(scores - m)
    probs = e * pl.reciprocal(jnp.sum(e, axis=-1, keepdims=True), approx=True)
    # TODO(synk): nn.Dropout(0.2) on probs intentionally skipped (eval mode).

    a = jnp.dot(
        probs.astype(jnp.bfloat16), v, preferred_element_type=jnp.float32
    )                                               # (TL*R, D) f32

    # law_d / accu_d / term_d stacked as columns of wd: (D, 3)
    d_heads = jnp.tanh(
        jnp.dot(a, wd_ref[...], preferred_element_type=jnp.float32) + bd_ref[...]
    )                                               # (TL*R, 3)
    d_heads = d_heads.reshape(tl, r, 3)

    # law1 / accu1 / term1 stacked as columns of w1: (R, 3); reduce over R
    s = jnp.sum(d_heads * w1_ref[...][None, :, :], axis=1) + b1_ref[...]  # (TL, 3)
    out_ref[...] = s.T[None, None]                  # (1, 1, 3, TL) lane dim = laws


def law_cross_attention(laws_q, facts_kv, attention_mask, wd, bd, w1, b1, *, law_tile):
    l, r, d = laws_q.shape
    f, s, d2 = facts_kv.shape
    tl = law_tile
    lt_count = pl.cdiv(l, tl)
    l_pad = lt_count * tl
    if l_pad != l:
        laws_q = jnp.pad(laws_q, ((0, l_pad - l), (0, 0), (0, 0)))
    mask3 = attention_mask.reshape(f, 1, s).astype(jnp.float32)

    out4 = pl.pallas_call(
        _law_cross_attn_kernel,
        out_shape=jax.ShapeDtypeStruct((lt_count, f, 3, tl), jnp.float32),
        grid_spec=pltpu.PrefetchScalarGridSpec(
            num_scalar_prefetch=0,
            grid=(lt_count, f),   # law tiles outer, facts inner -> laws_q resident
            in_specs=[
                pl.BlockSpec((tl, r, d), lambda lt, fi: (lt, 0, 0)),
                pl.BlockSpec((1, s, d2), lambda lt, fi: (fi, 0, 0)),
                pl.BlockSpec((1, 1, s), lambda lt, fi: (fi, 0, 0)),
                pl.BlockSpec((d, 3), lambda lt, fi: (0, 0)),
                pl.BlockSpec((1, 3), lambda lt, fi: (0, 0)),
                pl.BlockSpec((r, 3), lambda lt, fi: (0, 0)),
                pl.BlockSpec((1, 3), lambda lt, fi: (0, 0)),
            ],
            out_specs=pl.BlockSpec((1, 1, 3, tl), lambda lt, fi: (lt, fi, 0, 0)),
        ),
        compiler_params=pltpu.CompilerParams(
            dimension_semantics=("parallel", "parallel"),
            vmem_limit_bytes=_VMEM_LIMIT,
        ),
    )(laws_q, facts_kv, mask3, wd, bd, w1, b1)

    # (LT, F, 3, tl) -> lane-dense (F, 3, L_pad) slab for the heads kernel.
    p = jnp.transpose(out4, (1, 2, 0, 3)).reshape(f, 3, l_pad)
    return p, l_pad


# ----------------------------------------------------------------------------
# Kernel 3: final classification heads (accu2 / term2), law logits pass-through.
# Padded-law columns are nulled by zero-padded weight rows.
# ----------------------------------------------------------------------------
def _heads_kernel(p_ref, wa_ref, ba_ref, wt_ref, bt_ref, law_ref, accu_ref, term_ref):
    p = p_ref[...]                                  # (F, 3, L_pad)
    law_ref[...] = p[:, 0, :]
    accu_ref[...] = (
        jnp.dot(jnp.tanh(p[:, 1, :]), wa_ref[...], preferred_element_type=jnp.float32)
        + ba_ref[...]
    )
    term_ref[...] = (
        jnp.dot(jnp.tanh(p[:, 2, :]), wt_ref[...], preferred_element_type=jnp.float32)
        + bt_ref[...]
    )


def heads(p, wa, ba, wt, bt):
    f, _, l_pad = p.shape
    accu_cls = wa.shape[1]
    term_cls = wt.shape[1]
    return pl.pallas_call(
        _heads_kernel,
        out_shape=(
            jax.ShapeDtypeStruct((f, l_pad), jnp.float32),
            jax.ShapeDtypeStruct((f, accu_cls), jnp.float32),
            jax.ShapeDtypeStruct((f, term_cls), jnp.float32),
        ),
        grid_spec=pltpu.PrefetchScalarGridSpec(
            num_scalar_prefetch=0,
            grid=(1,),
            in_specs=[
                pl.BlockSpec((f, 3, l_pad), lambda i: (0, 0, 0)),
                pl.BlockSpec((l_pad, accu_cls), lambda i: (0, 0)),
                pl.BlockSpec((1, accu_cls), lambda i: (0, 0)),
                pl.BlockSpec((l_pad, term_cls), lambda i: (0, 0)),
                pl.BlockSpec((1, term_cls), lambda i: (0, 0)),
            ],
            out_specs=(
                pl.BlockSpec((f, l_pad), lambda i: (0, 0)),
                pl.BlockSpec((f, accu_cls), lambda i: (0, 0)),
                pl.BlockSpec((f, term_cls), lambda i: (0, 0)),
            ),
        ),
        compiler_params=pltpu.CompilerParams(
            dimension_semantics=("arbitrary",),
            vmem_limit_bytes=_VMEM_LIMIT,
        ),
    )(p, wa, ba, wt, bt)


# ----------------------------------------------------------------------------
# Full forward (glue in plain JAX, hot paths in Pallas)
# ----------------------------------------------------------------------------
def bert_legal_ca_forward(params, sequence_output, attention_mask, laws):
    f, s, d = sequence_output.shape
    l, r, _ = laws.shape
    inv_sqrt_d = 1.0 / math.sqrt(d)

    # Fold the 1/sqrt(D) attention scale into the law_q projection (zero cost);
    # store laws_q in bf16 (it is an MXU operand and the dominant HBM tensor).
    laws_q = pallas_linear(
        laws.reshape(l * r, d),
        params["law_q_w"] * inv_sqrt_d,
        params["law_q_b"] * inv_sqrt_d,
        out_dtype=jnp.bfloat16,
    ).reshape(l, r, d)

    # Fused K/V projection: one pass over sequence_output with (D, 2D) weights.
    kv_w = jnp.concatenate([params["fact_k_w"], params["fact_v_w"]], axis=1)
    kv_b = jnp.concatenate([params["fact_k_b"], params["fact_v_b"]], axis=1)
    facts_kv = pallas_linear(
        sequence_output.reshape(f * s, d), kv_w, kv_b, out_dtype=jnp.bfloat16
    ).reshape(f, s, 2 * d)

    # law_d / accu_d / term_d and law1 / accu1 / term1 stacked as 3 columns.
    wd = jnp.concatenate(
        [params["law_d_w"], params["accu_d_w"], params["term_d_w"]], axis=1
    )  # (D, 3)
    bd = jnp.concatenate(
        [params["law_d_b"], params["accu_d_b"], params["term_d_b"]], axis=1
    )  # (1, 3)
    w1 = jnp.concatenate(
        [params["law1_w"], params["accu1_w"], params["term1_w"]], axis=1
    )  # (R, 3)
    b1 = jnp.concatenate(
        [params["law1_b"], params["accu1_b"], params["term1_b"]], axis=1
    )  # (1, 3)

    tl = _choose_law_tile(l, r, d, s)
    p, l_pad = law_cross_attention(
        laws_q, facts_kv, attention_mask, wd, bd, w1, b1, law_tile=tl
    )

    # Zero-pad accu2 / term2 weight rows so padded law columns contribute nothing.
    wa, wt = params["accu2_w"], params["term2_w"]
    if l_pad != l:
        pad = ((0, l_pad - l), (0, 0))
        wa = jnp.pad(wa, pad)
        wt = jnp.pad(wt, pad)

    # Note: self.law2 is defined in the PyTorch module but never used in forward.
    law_pad, accu, term = heads(p, wa, params["accu2_b"], wt, params["term2_b"])
    return law_pad[:, :l], accu, term


# ----------------------------------------------------------------------------
# Pure-JAX reference of the same math (correctness sanity check)
# ----------------------------------------------------------------------------
def reference_forward(params, output, attention_mask, laws):
    d = output.shape[-1]
    laws_q = laws @ params["law_q_w"] + params["law_q_b"][0]
    facts_k = output @ params["fact_k_w"] + params["fact_k_b"][0]
    facts_v = output @ params["fact_v_w"] + params["fact_v_b"][0]
    scores = jnp.einsum("lrd,fsd->lfrs", laws_q, facts_k) / math.sqrt(d)
    scores = scores + (1.0 - attention_mask)[None, :, None, :] * -10000.0
    probs = jax.nn.softmax(scores, axis=-1)
    a = jnp.einsum("lfrs,fsd->lfrd", probs, facts_v)
    g = jnp.transpose(a, (1, 0, 2, 3))  # (F, L, R, D)

    d_law = jnp.tanh((g @ params["law_d_w"])[..., 0] + params["law_d_b"][0, 0])
    law = (d_law @ params["law1_w"])[..., 0] + params["law1_b"][0, 0]

    d_accu = jnp.tanh((g @ params["accu_d_w"])[..., 0] + params["accu_d_b"][0, 0])
    s_accu = jnp.tanh((d_accu @ params["accu1_w"])[..., 0] + params["accu1_b"][0, 0])
    accu = s_accu @ params["accu2_w"] + params["accu2_b"][0]

    d_term = jnp.tanh((g @ params["term_d_w"])[..., 0] + params["term_d_b"][0, 0])
    s_term = jnp.tanh((d_term @ params["term1_w"])[..., 0] + params["term1_b"][0, 0])
    term = s_term @ params["term2_w"] + params["term2_b"][0]
    return law, accu, term


# ----------------------------------------------------------------------------
# Deterministic parameter init + example run
# ----------------------------------------------------------------------------
def _init_linear(key, din, dout, scale=0.05):
    kw, kb = jax.random.split(key)
    w = jax.random.normal(kw, (din, dout), jnp.float32) * scale
    b = jax.random.normal(kb, (1, dout), jnp.float32) * scale
    return w, b


if __name__ == "__main__":
    # Small stand-in shapes (full model: D=768, L=103, R=512, S~512, ACCU=119, TERM=11).
    # L=12 is deliberately not a multiple of the law tile so the pad/mask path runs.
    F, S, D = 2, 8, 128
    L, R = 12, 16
    ACCU, TERM = 12, 11

    root = jax.random.PRNGKey(0)
    keys = jax.random.split(root, 16)

    # TODO(synk): stands in for CustomBertModel(bert-base-chinese) sequence_output
    sequence_output = jax.random.normal(keys[0], (F, S, D), jnp.float32)
    # TODO(synk): stands in for laws_rep.pkl
    laws = jax.random.normal(keys[1], (L, R, D), jnp.float32)
    lengths = jnp.array([[S], [S - 3]], dtype=jnp.int32)
    attention_mask = (jnp.arange(S)[None, :] < lengths).astype(jnp.float32)  # (F, S)

    params = {}
    params["law_q_w"], params["law_q_b"] = _init_linear(keys[2], D, D)
    params["fact_k_w"], params["fact_k_b"] = _init_linear(keys[3], D, D)
    params["fact_v_w"], params["fact_v_b"] = _init_linear(keys[4], D, D)
    params["law_d_w"], params["law_d_b"] = _init_linear(keys[5], D, 1)
    params["accu_d_w"], params["accu_d_b"] = _init_linear(keys[6], D, 1)
    params["term_d_w"], params["term_d_b"] = _init_linear(keys[7], D, 1)
    params["law1_w"], params["law1_b"] = _init_linear(keys[8], R, 1)
    params["accu1_w"], params["accu1_b"] = _init_linear(keys[9], R, 1)
    params["term1_w"], params["term1_b"] = _init_linear(keys[10], R, 1)
    params["law2_w"], params["law2_b"] = _init_linear(keys[11], L, L)  # unused in fwd
    params["accu2_w"], params["accu2_b"] = _init_linear(keys[12], L, ACCU)
    params["term2_w"], params["term2_b"] = _init_linear(keys[13], L, TERM)

    fwd = jax.jit(bert_legal_ca_forward)
    law_logits, accu_logits, term_logits = fwd(
        params, sequence_output, attention_mask, laws
    )
    jax.block_until_ready((law_logits, accu_logits, term_logits))

    assert law_logits.shape == (F, L)
    assert accu_logits.shape == (F, ACCU)
    assert term_logits.shape == (F, TERM)

    ref = reference_forward(params, sequence_output, attention_mask, laws)
    for got, want in zip((law_logits, accu_logits, term_logits), ref):
        assert bool(jnp.all(jnp.isfinite(got)))
        assert bool(jnp.allclose(got, want, atol=3e-2, rtol=3e-2)), float(
            jnp.max(jnp.abs(got - want))
        )

    print("KERNEL_OK")
</pallas_src>

<mosaic_0001>
module attributes {stable_mosaic.version = 11 : i64} {
  func.func @_linear_kernel(%arg0: i32, %arg1: memref<192x128xf32, #tpu.memory_space<vmem>>, %arg2: memref<128x128xf32, #tpu.memory_space<vmem>>, %arg3: memref<1x128xf32, #tpu.memory_space<vmem>>, %arg4: memref<192x128xbf16, #tpu.memory_space<vmem>>) attributes {dimension_semantics = [#tpu.dimension_semantics<parallel>], iteration_bounds = array<i64: 1>, scalar_prefetch = 0 : i64, scratch_operands = 0 : i64, tpu.core_type = #tpu.core_type<tc>, window_params = [{transform_indices = @transform_0, window_bounds = array<i64: 192, 128>}, {pipeline_mode = #tpu.pipeline_mode<synchronous>, transform_indices = @transform_1, window_bounds = array<i64: 128, 128>}, {pipeline_mode = #tpu.pipeline_mode<synchronous>, transform_indices = @transform_2, window_bounds = array<i64: 1, 128>}, {transform_indices = @transform_3, window_bounds = array<i64: 192, 128>}]} {
    %c0 = arith.constant 0 : index
    %c0_0 = arith.constant 0 : index
    %0 = vector.load %arg1[%c0, %c0_0] : memref<192x128xf32, #tpu.memory_space<vmem>>, vector<192x128xf32>
    %1 = arith.truncf %0 : vector<192x128xf32> to vector<192x128xbf16>
    %c0_1 = arith.constant 0 : index
    %c0_2 = arith.constant 0 : index
    %2 = vector.load %arg2[%c0_1, %c0_2] : memref<128x128xf32, #tpu.memory_space<vmem>>, vector<128x128xf32>
    %3 = arith.truncf %2 : vector<128x128xf32> to vector<128x128xbf16>
    %cst = arith.constant dense<0.000000e+00> : vector<192x128xf32>
    %4 = tpu.matmul %1, %3, %cst {dimension_numbers = #tpu.dot_dimension_numbers<[1], [0], [0], [1], [0, 0, 1, 1], [], []>} : vector<192x128xbf16>, vector<128x128xbf16>, vector<192x128xf32> -> vector<192x128xf32>
    %c0_3 = arith.constant 0 : index
    %c0_4 = arith.constant 0 : index
    %5 = vector.load %arg3[%c0_3, %c0_4] : memref<1x128xf32, #tpu.memory_space<vmem>>, vector<1x128xf32>
    %6 = vector.broadcast %5 : vector<1x128xf32> to vector<192x128xf32>
    %7 = arith.addf %4, %6 : vector<192x128xf32>
    %8 = arith.truncf %7 : vector<192x128xf32> to vector<192x128xbf16>
    %c0_5 = arith.constant 0 : index
    %c0_6 = arith.constant 0 : index
    %9 = vector.load %arg4[%c0_5, %c0_6] : memref<192x128xbf16, #tpu.memory_space<vmem>>, vector<192x128xbf16>
    tpu.vector_store %arg4[%c0_5, %c0_6], %8 {strides = array<i32>} : memref<192x128xbf16, #tpu.memory_space<vmem>>, vector<192x128xbf16>,
    return
  }
  func.func @transform_0(%arg0: i32) -> (i32, i32) {
    %c0_i32 = arith.constant 0 : i32
    %c0_i32_0 = arith.constant 0 : i32
    return %arg0, %c0_i32 : i32, i32
  }
  func.func @transform_1(%arg0: i32) -> (i32, i32) {
    %c0_i32 = arith.constant 0 : i32
    %c0_i32_0 = arith.constant 0 : i32
    %c0_i32_1 = arith.constant 0 : i32
    return %c0_i32, %c0_i32_0 : i32, i32
  }
  func.func @transform_2(%arg0: i32) -> (i32, i32) {
    %c0_i32 = arith.constant 0 : i32
    %c0_i32_0 = arith.constant 0 : i32
    %c0_i32_1 = arith.constant 0 : i32
    return %c0_i32, %c0_i32_0 : i32, i32
  }
  func.func @transform_3(%arg0: i32) -> (i32, i32) {
    %c0_i32 = arith.constant 0 : i32
    %c0_i32_0 = arith.constant 0 : i32
    return %arg0, %c0_i32 : i32, i32
  }
}

module attributes {stable_mosaic.version = 11 : i64} {
  func.func @_linear_kernel(%arg0: i32, %arg1: memref<16x128xf32, #tpu.memory_space<vmem>>, %arg2: memref<128x256xf32, #tpu.memory_space<vmem>>, %arg3: memref<1x256xf32, #tpu.memory_space<vmem>>, %arg4: memref<16x256xbf16, #tpu.memory_space<vmem>>) attributes {dimension_semantics = [#tpu.dimension_semantics<parallel>], iteration_bounds = array<i64: 1>, scalar_prefetch = 0 : i64, scratch_operands = 0 : i64, tpu.core_type = #tpu.core_type<tc>, window_params = [{transform_indices = @transform_0, window_bounds = array<i64: 16, 128>}, {pipeline_mode = #tpu.pipeline_mode<synchronous>, transform_indices = @transform_1, window_bounds = array<i64: 128, 256>}, {pipeline_mode = #tpu.pipeline_mode<synchronous>, transform_indices = @transform_2, window_bounds = array<i64: 1, 256>}, {transform_indices = @transform_3, window_bounds = array<i64: 16, 256>}]} {
    %c0 = arith.constant 0 : index
    %c0_0 = arith.constant 0 : index
    %0 = vector.load %arg1[%c0, %c0_0] : memref<16x128xf32, #tpu.memory_space<vmem>>, vector<16x128xf32>
    %1 = arith.truncf %0 : vector<16x128xf32> to vector<16x128xbf16>
    %c0_1 = arith.constant 0 : index
    %c0_2 = arith.constant 0 : index
    %2 = vector.load %arg2[%c0_1, %c0_2] : memref<128x256xf32, #tpu.memory_space<vmem>>, vector<128x256xf32>
    %3 = arith.truncf %2 : vector<128x256xf32> to vector<128x256xbf16>
    %cst = arith.constant dense<0.000000e+00> : vector<16x256xf32>
    %4 = tpu.matmul %1, %3, %cst {dimension_numbers = #tpu.dot_dimension_numbers<[1], [0], [0], [1], [0, 0, 1, 1], [], []>} : vector<16x128xbf16>, vector<128x256xbf16>, vector<16x256xf32> -> vector<16x256xf32>
    %c0_3 = arith.constant 0 : index
    %c0_4 = arith.constant 0 : index
    %5 = vector.load %arg3[%c0_3, %c0_4] : memref<1x256xf32, #tpu.memory_space<vmem>>, vector<1x256xf32>
    %6 = vector.broadcast %5 : vector<1x256xf32> to vector<16x256xf32>
    %7 = arith.addf %4, %6 : vector<16x256xf32>
    %8 = arith.truncf %7 : vector<16x256xf32> to vector<16x256xbf16>
    %c0_5 = arith.constant 0 : index
    %c0_6 = arith.constant 0 : index
    %9 = vector.load %arg4[%c0_5, %c0_6] : memref<16x256xbf16, #tpu.memory_space<vmem>>, vector<16x256xbf16>
    tpu.vector_store %arg4[%c0_5, %c0_6], %8 {strides = array<i32>} : memref<16x256xbf16, #tpu.memory_space<vmem>>, vector<16x256xbf16>,
    return
  }
  func.func @transform_0(%arg0: i32) -> (i32, i32) {
    %c0_i32 = arith.constant 0 : i32
    %c0_i32_0 = arith.constant 0 : i32
    return %arg0, %c0_i32 : i32, i32
  }
  func.func @transform_1(%arg0: i32) -> (i32, i32) {
    %c0_i32 = arith.constant 0 : i32
    %c0_i32_0 = arith.constant 0 : i32
    %c0_i32_1 = arith.constant 0 : i32
    return %c0_i32, %c0_i32_0 : i32, i32
  }
  func.func @transform_2(%arg0: i32) -> (i32, i32) {
    %c0_i32 = arith.constant 0 : i32
    %c0_i32_0 = arith.constant 0 : i32
    %c0_i32_1 = arith.constant 0 : i32
    return %c0_i32, %c0_i32_0 : i32, i32
  }
  func.func @transform_3(%arg0: i32) -> (i32, i32) {
    %c0_i32 = arith.constant 0 : i32
    %c0_i32_0 = arith.constant 0 : i32
    return %arg0, %c0_i32 : i32, i32
  }
}

module attributes {stable_mosaic.version = 11 : i64} {
  func.func @_law_cross_attn_kernel(%arg0: i32, %arg1: i32, %arg2: memref<8x16x128xbf16, #tpu.memory_space<vmem>>, %arg3: memref<1x8x256xbf16, #tpu.memory_space<vmem>>, %arg4: memref<1x1x8xf32, #tpu.memory_space<vmem>>, %arg5: memref<128x3xf32, #tpu.memory_space<vmem>>, %arg6: memref<1x3xf32, #tpu.memory_space<vmem>>, %arg7: memref<16x3xf32, #tpu.memory_space<vmem>>, %arg8: memref<1x3xf32, #tpu.memory_space<vmem>>, %arg9: memref<1x1x3x8xf32, #tpu.memory_space<vmem>>) attributes {dimension_semantics = [#tpu.dimension_semantics<parallel>, #tpu.dimension_semantics<parallel>], iteration_bounds = array<i64: 2, 2>, scalar_prefetch = 0 : i64, scratch_operands = 0 : i64, tpu.core_type = #tpu.core_type<tc>, window_params = [{transform_indices = @transform_0, window_bounds = array<i64: 8, 16, 128>}, {transform_indices = @transform_1, window_bounds = array<i64: 1, 8, 256>}, {transform_indices = @transform_2, window_bounds = array<i64: 1, 1, 8>}, {pipeline_mode = #tpu.pipeline_mode<synchronous>, transform_indices = @transform_3, window_bounds = array<i64: 128, 3>}, {pipeline_mode = #tpu.pipeline_mode<synchronous>, transform_indices = @transform_4, window_bounds = array<i64: 1, 3>}, {pipeline_mode = #tpu.pipeline_mode<synchronous>, transform_indices = @transform_5, window_bounds = array<i64: 16, 3>}, {pipeline_mode = #tpu.pipeline_mode<synchronous>, transform_indices = @transform_6, window_bounds = array<i64: 1, 3>}, {transform_indices = @transform_7, window_bounds = array<i64: 1, 1, 3, 8>}]} {
    %c0 = arith.constant 0 : index
    %c0_0 = arith.constant 0 : index
    %c0_1 = arith.constant 0 : index
    %0 = vector.load %arg2[%c0, %c0_0, %c0_1] : memref<8x16x128xbf16, #tpu.memory_space<vmem>>, vector<8x16x128xbf16>
    %1 = vector.shape_cast %0 : vector<8x16x128xbf16> to vector<128x128xbf16>
    %c0_2 = arith.constant 0 : index
    %c0_3 = arith.constant 0 : index
    %c0_4 = arith.constant 0 : index
    %2 = vector.load %arg3[%c0_2, %c0_3, %c0_4] : memref<1x8x256xbf16, #tpu.memory_space<vmem>>, vector<1x8x256xbf16>
    %3 = vector.shape_cast %2 : vector<1x8x256xbf16> to vector<8x256xbf16>
    %4 = vector.extract_strided_slice %3 {offsets = [0, 0], sizes = [8, 128], strides = [1, 1]} : vector<8x256xbf16> to vector<8x128xbf16>
    %5 = vector.extract_strided_slice %3 {offsets = [0, 128], sizes = [8, 128], strides = [1, 1]} : vector<8x256xbf16> to vector<8x128xbf16>
    %c0_5 = arith.constant 0 : index
    %c0_6 = arith.constant 0 : index
    %c0_7 = arith.constant 0 : index
    %6 = vector.load %arg4[%c0_5, %c0_6, %c0_7] : memref<1x1x8xf32, #tpu.memory_space<vmem>>, vector<1x1x8xf32>
    %7 = vector.shape_cast %6 : vector<1x1x8xf32> to vector<1x8xf32>
    %cst = arith.constant 1.000000e+00 : f32
    %8 = vector.broadcast %cst : f32 to vector<1x8xf32>
    %9 = arith.subf %8, %7 : vector<1x8xf32>
    %cst_8 = arith.constant -1.000000e+04 : f32
    %10 = vector.broadcast %cst_8 : f32 to vector<1x8xf32>
    %11 = arith.mulf %9, %10 : vector<1x8xf32>
    %cst_9 = arith.constant dense<0.000000e+00> : vector<128x8xf32>
    %12 = tpu.matmul %1, %4, %cst_9 {dimension_numbers = #tpu.dot_dimension_numbers<[1], [1], [0], [0], [0, 0, 1, 0], [], []>} : vector<128x128xbf16>, vector<8x128xbf16>, vector<128x8xf32> -> vector<128x8xf32>
    %13 = vector.broadcast %11 : vector<1x8xf32> to vector<128x8xf32>
    %14 = arith.addf %12, %13 : vector<128x8xf32>
    %cst_10 = arith.constant dense<0xFF800000> : vector<128xf32>
    %15 = vector.multi_reduction <maximumf>, %14, %cst_10 [1] : vector<128x8xf32> to vector<128xf32>
    %16 = vector.shape_cast %15 : vector<128xf32> to vector<128x1xf32>
    %17 = vector.broadcast %16 : vector<128x1xf32> to vector<128x8xf32>
    %18 = arith.subf %14, %17 : vector<128x8xf32>
    %19 = math.exp %18 : vector<128x8xf32>
    %cst_11 = arith.constant dense<0.000000e+00> : vector<128xf32>
    %20 = vector.multi_reduction <add>, %19, %cst_11 [1] : vector<128x8xf32> to vector<128xf32>
    %21 = vector.shape_cast %20 : vector<128xf32> to vector<128x1xf32>
    %22 = tpu.reciprocal %21 {approx = true} : vector<128x1xf32> -> vector<128x1xf32>
    %23 = vector.broadcast %22 : vector<128x1xf32> to vector<128x8xf32>
    %24 = arith.mulf %19, %23 : vector<128x8xf32>
    %25 = arith.truncf %24 : vector<128x8xf32> to vector<128x8xbf16>
    %cst_12 = arith.constant dense<0.000000e+00> : vector<128x128xf32>
    %26 = tpu.matmul %25, %5, %cst_12 {dimension_numbers = #tpu.dot_dimension_numbers<[1], [0], [0], [1], [0, 0, 1, 1], [], []>} : vector<128x8xbf16>, vector<8x128xbf16>, vector<128x128xf32> -> vector<128x128xf32>
    %c0_13 = arith.constant 0 : index
    %c0_14 = arith.constant 0 : index
    %27 = vector.load %arg5[%c0_13, %c0_14] : memref<128x3xf32, #tpu.memory_space<vmem>>, vector<128x3xf32>
    %cst_15 = arith.constant dense<0.000000e+00> : vector<128x3xf32>
    %28 = tpu.matmul %26, %27, %cst_15 {dimension_numbers = #tpu.dot_dimension_numbers<[1], [0], [0], [1], [0, 0, 1, 1], [], []>} : vector<128x128xf32>, vector<128x3xf32>, vector<128x3xf32> -> vector<128x3xf32>
    %c0_16 = arith.constant 0 : index
    %c0_17 = arith.constant 0 : index
    %29 = vector.load %arg6[%c0_16, %c0_17] : memref<1x3xf32, #tpu.memory_space<vmem>>, vector<1x3xf32>
    %30 = vector.broadcast %29 : vector<1x3xf32> to vector<128x3xf32>
    %31 = arith.addf %28, %30 : vector<128x3xf32>
    %32 = math.tanh %31 : vector<128x3xf32>
    %33 = vector.shape_cast %32 : vector<128x3xf32> to vector<8x16x3xf32>
    %c0_18 = arith.constant 0 : index
    %c0_19 = arith.constant 0 : index
    %34 = vector.load %arg7[%c0_18, %c0_19] : memref<16x3xf32, #tpu.memory_space<vmem>>, vector<16x3xf32>
    %35 = vector.shape_cast %34 : vector<16x3xf32> to vector<1x16x3xf32>
    %36 = vector.broadcast %35 : vector<1x16x3xf32> to vector<8x16x3xf32>
    %37 = arith.mulf %33, %36 : vector<8x16x3xf32>
    %cst_20 = arith.constant dense<0.000000e+00> : vector<8x3xf32>
    %38 = vector.multi_reduction <add>, %37, %cst_20 [1] : vector<8x16x3xf32> to vector<8x3xf32>
    %c0_21 = arith.constant 0 : index
    %c0_22 = arith.constant 0 : index
    %39 = vector.load %arg8[%c0_21, %c0_22] : memref<1x3xf32, #tpu.memory_space<vmem>>, vector<1x3xf32>
    %40 = vector.broadcast %39 : vector<1x3xf32> to vector<8x3xf32>
    %41 = arith.addf %38, %40 : vector<8x3xf32>
    %42 = tpu.transpose %41, [1, 0] : vector<8x3xf32> -> vector<3x8xf32>
    %43 = vector.shape_cast %42 : vector<3x8xf32> to vector<1x1x3x8xf32>
    %c0_23 = arith.constant 0 : index
    %c0_24 = arith.constant 0 : index
    %c0_25 = arith.constant 0 : index
    %c0_26 = arith.constant 0 : index
    %44 = vector.load %arg9[%c0_23, %c0_24, %c0_25, %c0_26] : memref<1x1x3x8xf32, #tpu.memory_space<vmem>>, vector<1x1x3x8xf32>
    tpu.vector_store %arg9[%c0_23, %c0_24, %c0_25, %c0_26], %43 {strides = array<i32>} : memref<1x1x3x8xf32, #tpu.memory_space<vmem>>, vector<1x1x3x8xf32>,
    return
  }
  func.func @transform_0(%arg0: i32, %arg1: i32) -> (i32, i32, i32) {
    %c0_i32 = arith.constant 0 : i32
    %c0_i32_0 = arith.constant 0 : i32
    %c0_i32_1 = arith.constant 0 : i32
    return %arg0, %c0_i32, %c0_i32_0 : i32, i32, i32
  }
  func.func @transform_1(%arg0: i32, %arg1: i32) -> (i32, i32, i32) {
    %c0_i32 = arith.constant 0 : i32
    %c0_i32_0 = arith.constant 0 : i32
    %c0_i32_1 = arith.constant 0 : i32
    return %arg1, %c0_i32, %c0_i32_0 : i32, i32, i32
  }
  func.func @transform_2(%arg0: i32, %arg1: i32) -> (i32, i32, i32) {
    %c0_i32 = arith.constant 0 : i32
    %c0_i32_0 = arith.constant 0 : i32
    %c0_i32_1 = arith.constant 0 : i32
    return %arg1, %c0_i32, %c0_i32_0 : i32, i32, i32
  }
  func.func @transform_3(%arg0: i32, %arg1: i32) -> (i32, i32) {
    %c0_i32 = arith.constant 0 : i32
    %c0_i32_0 = arith.constant 0 : i32
    %c0_i32_1 = arith.constant 0 : i32
    return %c0_i32, %c0_i32_0 : i32, i32
  }
  func.func @transform_4(%arg0: i32, %arg1: i32) -> (i32, i32) {
    %c0_i32 = arith.constant 0 : i32
    %c0_i32_0 = arith.constant 0 : i32
    %c0_i32_1 = arith.constant 0 : i32
    return %c0_i32, %c0_i32_0 : i32, i32
  }
  func.func @transform_5(%arg0: i32, %arg1: i32) -> (i32, i32) {
    %c0_i32 = arith.constant 0 : i32
    %c0_i32_0 = arith.constant 0 : i32
    %c0_i32_1 = arith.constant 0 : i32
    return %c0_i32, %c0_i32_0 : i32, i32
  }
  func.func @transform_6(%arg0: i32, %arg1: i32) -> (i32, i32) {
    %c0_i32 = arith.constant 0 : i32
    %c0_i32_0 = arith.constant 0 : i32
    %c0_i32_1 = arith.constant 0 : i32
    return %c0_i32, %c0_i32_0 : i32, i32
  }
  func.func @transform_7(%arg0: i32, %arg1: i32) -> (i32, i32, i32, i32) {
    %c0_i32 = arith.constant 0 : i32
    %c0_i32_0 = arith.constant 0 : i32
    %c0_i32_1 = arith.constant 0 : i32
    return %arg0, %arg1, %c0_i32, %c0_i32_0 : i32, i32, i32, i32
  }
}

module attributes {stable_mosaic.version = 11 : i64} {
  func.func @_heads_kernel(%arg0: i32, %arg1: memref<2x3x16xf32, #tpu.memory_space<vmem>>, %arg2: memref<16x12xf32, #tpu.memory_space<vmem>>, %arg3: memref<1x12xf32, #tpu.memory_space<vmem>>, %arg4: memref<16x11xf32, #tpu.memory_space<vmem>>, %arg5: memref<1x11xf32, #tpu.memory_space<vmem>>, %arg6: memref<2x16xf32, #tpu.memory_space<vmem>>, %arg7: memref<2x12xf32, #tpu.memory_space<vmem>>, %arg8: memref<2x11xf32, #tpu.memory_space<vmem>>) attributes {dimension_semantics = [#tpu.dimension_semantics<arbitrary>], iteration_bounds = array<i64: 1>, scalar_prefetch = 0 : i64, scratch_operands = 0 : i64, tpu.core_type = #tpu.core_type<tc>, window_params = [{pipeline_mode = #tpu.pipeline_mode<synchronous>, transform_indices = @transform_0, window_bounds = array<i64: 2, 3, 16>}, {pipeline_mode = #tpu.pipeline_mode<synchronous>, transform_indices = @transform_1, window_bounds = array<i64: 16, 12>}, {pipeline_mode = #tpu.pipeline_mode<synchronous>, transform_indices = @transform_2, window_bounds = array<i64: 1, 12>}, {pipeline_mode = #tpu.pipeline_mode<synchronous>, transform_indices = @transform_3, window_bounds = array<i64: 16, 11>}, {pipeline_mode = #tpu.pipeline_mode<synchronous>, transform_indices = @transform_4, window_bounds = array<i64: 1, 11>}, {pipeline_mode = #tpu.pipeline_mode<synchronous>, transform_indices = @transform_5, window_bounds = array<i64: 2, 16>}, {pipeline_mode = #tpu.pipeline_mode<synchronous>, transform_indices = @transform_6, window_bounds = array<i64: 2, 12>}, {pipeline_mode = #tpu.pipeline_mode<synchronous>, transform_indices = @transform_7, window_bounds = array<i64: 2, 11>}]} {
    %c0 = arith.constant 0 : index
    %c0_0 = arith.constant 0 : index
    %c0_1 = arith.constant 0 : index
    %0 = vector.load %arg1[%c0, %c0_0, %c0_1] : memref<2x3x16xf32, #tpu.memory_space<vmem>>, vector<2x3x16xf32>
    %1 = vector.extract_strided_slice %0 {offsets = [0, 0, 0], sizes = [2, 1, 16], strides = [1, 1, 1]} : vector<2x3x16xf32> to vector<2x1x16xf32>
    %2 = vector.shape_cast %1 : vector<2x1x16xf32> to vector<2x16xf32>
    %c0_2 = arith.constant 0 : index
    %c0_3 = arith.constant 0 : index
    %3 = vector.load %arg6[%c0_2, %c0_3] : memref<2x16xf32, #tpu.memory_space<vmem>>, vector<2x16xf32>
    tpu.vector_store %arg6[%c0_2, %c0_3], %2 {strides = array<i32>} : memref<2x16xf32, #tpu.memory_space<vmem>>, vector<2x16xf32>,
    %4 = vector.extract_strided_slice %0 {offsets = [0, 1, 0], sizes = [2, 1, 16], strides = [1, 1, 1]} : vector<2x3x16xf32> to vector<2x1x16xf32>
    %5 = vector.shape_cast %4 : vector<2x1x16xf32> to vector<2x16xf32>
    %6 = math.tanh %5 : vector<2x16xf32>
    %c0_4 = arith.constant 0 : index
    %c0_5 = arith.constant 0 : index
    %7 = vector.load %arg2[%c0_4, %c0_5] : memref<16x12xf32, #tpu.memory_space<vmem>>, vector<16x12xf32>
    %cst = arith.constant dense<0.000000e+00> : vector<2x12xf32>
    %8 = tpu.matmul %6, %7, %cst {dimension_numbers = #tpu.dot_dimension_numbers<[1], [0], [0], [1], [0, 0, 1, 1], [], []>} : vector<2x16xf32>, vector<16x12xf32>, vector<2x12xf32> -> vector<2x12xf32>
    %c0_6 = arith.constant 0 : index
    %c0_7 = arith.constant 0 : index
    %9 = vector.load %arg3[%c0_6, %c0_7] : memref<1x12xf32, #tpu.memory_space<vmem>>, vector<1x12xf32>
    %10 = vector.broadcast %9 : vector<1x12xf32> to vector<2x12xf32>
    %11 = arith.addf %8, %10 : vector<2x12xf32>
    %c0_8 = arith.constant 0 : index
    %c0_9 = arith.constant 0 : index
    %12 = vector.load %arg7[%c0_8, %c0_9] : memref<2x12xf32, #tpu.memory_space<vmem>>, vector<2x12xf32>
    tpu.vector_store %arg7[%c0_8, %c0_9], %11 {strides = array<i32>} : memref<2x12xf32, #tpu.memory_space<vmem>>, vector<2x12xf32>,
    %13 = vector.extract_strided_slice %0 {offsets = [0, 2, 0], sizes = [2, 1, 16], strides = [1, 1, 1]} : vector<2x3x16xf32> to vector<2x1x16xf32>
    %14 = vector.shape_cast %13 : vector<2x1x16xf32> to vector<2x16xf32>
    %15 = math.tanh %14 : vector<2x16xf32>
    %c0_10 = arith.constant 0 : index
    %c0_11 = arith.constant 0 : index
    %16 = vector.load %arg4[%c0_10, %c0_11] : memref<16x11xf32, #tpu.memory_space<vmem>>, vector<16x11xf32>
    %cst_12 = arith.constant dense<0.000000e+00> : vector<2x11xf32>
    %17 = tpu.matmul %15, %16, %cst_12 {dimension_numbers = #tpu.dot_dimension_numbers<[1], [0], [0], [1], [0, 0, 1, 1], [], []>} : vector<2x16xf32>, vector<16x11xf32>, vector<2x11xf32> -> vector<2x11xf32>
    %c0_13 = arith.constant 0 : index
    %c0_14 = arith.constant 0 : index
    %18 = vector.load %arg5[%c0_13, %c0_14] : memref<1x11xf32, #tpu.memory_space<vmem>>, vector<1x11xf32>
    %19 = vector.broadcast %18 : vector<1x11xf32> to vector<2x11xf32>
    %20 = arith.addf %17, %19 : vector<2x11xf32>
    %c0_15 = arith.constant 0 : index
    %c0_16 = arith.constant 0 : index
    %21 = vector.load %arg8[%c0_15, %c0_16] : memref<2x11xf32, #tpu.memory_space<vmem>>, vector<2x11xf32>
    tpu.vector_store %arg8[%c0_15, %c0_16], %20 {strides = array<i32>} : memref<2x11xf32, #tpu.memory_space<vmem>>, vector<2x11xf32>,
    return
  }
  func.func @transform_0(%arg0: i32) -> (i32, i32, i32) {
    %c0_i32 = arith.constant 0 : i32
    %c0_i32_0 = arith.constant 0 : i32
    %c0_i32_1 = arith.constant 0 : i32
    %c0_i32_2 = arith.constant 0 : i32
    return %c0_i32, %c0_i32_0, %c0_i32_1 : i32, i32, i32
  }
  func.func @transform_1(%arg0: i32) -> (i32, i32) {
    %c0_i32 = arith.constant 0 : i32
    %c0_i32_0 = arith.constant 0 : i32
    %c0_i32_1 = arith.constant 0 : i32
    return %c0_i32, %c0_i32_0 : i32, i32
  }
  func.func @transform_2(%arg0: i32) -> (i32, i32) {
    %c0_i32 = arith.constant 0 : i32
    %c0_i32_0 = arith.constant 0 : i32
    %c0_i32_1 = arith.constant 0 : i32
    return %c0_i32, %c0_i32_0 : i32, i32
  }
  func.func @transform_3(%arg0: i32) -> (i32, i32) {
    %c0_i32 = arith.constant 0 : i32
    %c0_i32_0 = arith.constant 0 : i32
    %c0_i32_1 = arith.constant 0 : i32
    return %c0_i32, %c0_i32_0 : i32, i32
  }
  func.func @transform_4(%arg0: i32) -> (i32, i32) {
    %c0_i32 = arith.constant 0 : i32
    %c0_i32_0 = arith.constant 0 : i32
    %c0_i32_1 = arith.constant 0 : i32
    return %c0_i32, %c0_i32_0 : i32, i32
  }
  func.func @transform_5(%arg0: i32) -> (i32, i32) {
    %c0_i32 = arith.constant 0 : i32
    %c0_i32_0 = arith.constant 0 : i32
    %c0_i32_1 = arith.constant 0 : i32
    return %c0_i32, %c0_i32_0 : i32, i32
  }
  func.func @transform_6(%arg0: i32) -> (i32, i32) {
    %c0_i32 = arith.constant 0 : i32
    %c0_i32_0 = arith.constant 0 : i32
    %c0_i32_1 = arith.constant 0 : i32
    return %c0_i32, %c0_i32_0 : i32, i32
  }
  func.func @transform_7(%arg0: i32) -> (i32, i32) {
    %c0_i32 = arith.constant 0 : i32
    %c0_i32_0 = arith.constant 0 : i32
    %c0_i32_1 = arith.constant 0 : i32
    return %c0_i32, %c0_i32_0 : i32, i32
  }
}

</mosaic_0001>

<bundles_post_ra>
// kernel: bert_legal_ca_forward.5
= control target key start
LH: loop header
LB: loop body
LE: loop exit
PB: predicated region body
PF: predicated region fallthrough
CT: control target
= control target key end

     0   :  { %s238_s1 = inlined_call_operand.vmem [shape: f32[128,256], index: 1, kind: input, shape index: {}]   ;;  %s239_s0 = inlined_call_operand.vmem [shape: f32[16,128], index: 0, kind: input, shape index: {}]   ;;  %s240_s2 = inlined_call_operand.vmem [shape: f32[1,256], index: 2, kind: input, shape index: {}]   ;;  %s241_s3 = inlined_call_operand.vmem [shape: bf16[16,256], index: 3, kind: output, shape index: {}]  }
   0x1   :  { %v45_v0 = vld [vmem:[%s238_s1 + $0xe0] sm:$0xff]  ;;  %v47_v1 = vld [vmem:[%s238_s1 + $0xf0] sm:$0xff]  ;;  %v46_v2 = vld [vmem:[%s238_s1 + $0xe8] sm:$0xff] }
   0x2   :  { %v63_v3 = vpack.c.bf16 %v47_v1, %v45_v0  ;;  %v48_v4 = vld [vmem:[%s238_s1 + $0xf8] sm:$0xff]  ;;  %v41_v5 = vld [vmem:[%s238_s1 + $0xc0] sm:$0xff]  ;;  %v43_v6 = vld [vmem:[%s238_s1 + $0xd0] sm:$0xff] }
   0x3   :  { %v64_v7 = vpack.c.bf16 %v48_v4, %v46_v2  ;;  %v42_v8 = vld [vmem:[%s238_s1 + $0xc8] sm:$0xff]  ;;  %v44_v9 = vld [vmem:[%s238_s1 + $0xd8] sm:$0xff]  ;;  %v61_v10 = vpack.c.bf16 %v43_v6, %v41_v5  ;;  %v37_v12 = vld [vmem:[%s238_s1 + $0xa0] sm:$0xff] }
   0x4   :  { %71 = vmatpush.bf16.msra.mxu0 %v63_v3  ;;  %v62_v11 = vpack.c.bf16 %v44_v9, %v42_v8  ;;  %v39_v13 = vld [vmem:[%s238_s1 + $0xb0] sm:$0xff]  ;;  %v38_v14 = vld [vmem:[%s238_s1 + $0xa8] sm:$0xff]  ;;  %v40_v15 = vld [vmem:[%s238_s1 + $0xb8] sm:$0xff] }
   0x5   :  { %85 = vmatpush.bf16.msra.mxu1 %v64_v7  ;;  %v59_v16 = vpack.c.bf16 %v39_v13, %v37_v12  ;;  %v60_v17 = vpack.c.bf16 %v40_v15, %v38_v14  ;;  %v33_v18 = vld [vmem:[%s238_s1 + $0x80] sm:$0xff]  ;;  %v35_v19 = vld [vmem:[%s238_s1 + $0x90] sm:$0xff]  ;;  %v34_v20 = vld [vmem:[%s238_s1 + $0x88] sm:$0xff] }
   0x6   :  { %v36_v21 = vld [vmem:[%s238_s1 + $0x98] sm:$0xff]  ;;  %v57_v22 = vpack.c.bf16 %v35_v19, %v33_v18  ;;  %v29_v24 = vld [vmem:[%s238_s1 + $0x60] sm:$0xff]  ;;  %v31_v25 = vld [vmem:[%s238_s1 + $0x70] sm:$0xff] }
   0x7   :  { %v58_v23 = vpack.c.bf16 %v36_v21, %v34_v20  ;;  %v30_v26 = vld [vmem:[%s238_s1 + $0x68] sm:$0xff]  ;;  %v32_v27 = vld [vmem:[%s238_s1 + $0x78] sm:$0xff]  ;;  %v55_v28 = vpack.c.bf16 %v31_v25, %v29_v24  ;;  %v25_v30 = vld [vmem:[%s238_s1 + $0x40] sm:$0xff] }
   0x8   :  { %72 = vmatpush.bf16.msra.mxu0 %v61_v10  ;;  %v56_v29 = vpack.c.bf16 %v32_v27, %v30_v26  ;;  %v27_v31 = vld [vmem:[%s238_s1 + $0x50] sm:$0xff]  ;;  %v26_v32 = vld [vmem:[%s238_s1 + $0x48] sm:$0xff]  ;;  %v28_v33 = vld [vmem:[%s238_s1 + $0x58] sm:$0xff] }
   0x9   :  { %86 = vmatpush.bf16.msra.mxu1 %v62_v11  ;;  %v53_v34 = vpack.c.bf16 %v27_v31, %v25_v30  ;;  %v54_v35 = vpack.c.bf16 %v28_v33, %v26_v32  ;;  %v21_v36 = vld [vmem:[%s238_s1 + $0x20] sm:$0xff]  ;;  %v23_v37 = vld [vmem:[%s238_s1 + $0x30] sm:$0xff]  ;;  %v22_v38 = vld [vmem:[%s238_s1 + $0x28] sm:$0xff] }
   0xa   :  { %v24_v39 = vld [vmem:[%s238_s1 + $0x38] sm:$0xff]  ;;  %v51_v40 = vpack.c.bf16 %v23_v37, %v21_v36  ;;  %v17_v42 = vld [vmem:[%s238_s1] sm:$0xff]  ;;  %v19_v43 = vld [vmem:[%s238_s1 + $0x10] sm:$0xff] }
   0xb   :  { %v52_v41 = vpack.c.bf16 %v24_v39, %v22_v38  ;;  %v18_v44 = vld [vmem:[%s238_s1 + $0x8] sm:$0xff]  ;;  %v20_v45 = vld [vmem:[%s238_s1 + $0x18] sm:$0xff]  ;;  %v49_v46 = vpack.c.bf16 %v19_v43, %v17_v42  ;;  %v14_v47 = vld [vmem:[%s239_s0] sm:$0xff] }
   0xc   :  { %73 = vmatpush.bf16.msra.mxu0 %v59_v16  ;;  %v15_v48 = vld [vmem:[%s239_s0 + $0x8] sm:$0xff]  ;;  %v50_v49 = vpack.c.bf16 %v20_v45, %v18_v44  ;;  %v65_v51 = vld [vmem:[%s240_s2] sm:$0x3] }
   0xd   :  { %87 = vmatpush.bf16.msra.mxu1 %v60_v17  ;;  %v16_v50 = vpack.c.bf16 %v15_v48, %v14_v47  ;;  %v67_v52 = vperm.slane %v65_v51, 0  ;;  %v68_v53 = vperm.slane %v65_v51, 1 }
  0x10   :  { %74 = vmatpush.bf16.msra.mxu0 %v57_v22 }
  0x11   :  { %88 = vmatpush.bf16.msra.mxu1 %v58_v23 }
  0x14   :  { %75 = vmatpush.bf16.msra.mxu0 %v55_v28 }
  0x15   :  { %89 = vmatpush.bf16.msra.mxu1 %v56_v29 }
  0x18   :  { %76 = vmatpush.bf16.msra.mxu0 %v53_v34 }
  0x19   :  { %90 = vmatpush.bf16.msra.mxu1 %v54_v35 }
  0x1c   :  { %77 = vmatpush.bf16.msra.mxu0 %v51_v40 }
  0x1d   :  { %91 = vmatpush.bf16.msra.mxu1 %v52_v41 }
  0x20   :  { %78 = vmatpush.bf16.msra.mxu0 %v49_v46 }
  0x21   :  { %92 = vmatpush.bf16.msra.mxu1 %v50_v49 }
  0x23   :  { %79 = vmatmul.bf16.vlgmr.msra.gmra.mxu0 %v16_v50 }
  0x24   :  { %93 = vmatmul.bf16.vlgmr.msra.gmra.mxu1 %v16_v50 }
  0xa0   :  { %v80_v54 = vpop.f32.mrf.mxu0 }
  0xa1   :  { %v81_v55 = vadd.f32 %v80_v54, %v67_v52  ;;  %v94_v56 = vpop.f32.mrf.mxu1 }
  0xa2   :  { %v95_v57 = vadd.f32 %v94_v56, %v68_v53 }
  0xa4   :  { %v99_v58 = vpack.c.bf16 %v95_v57, %v81_v55 }
  0xa6   :  { %101 = vst [vmem:[%s241_s3] sm:$0xff] %v99_v58 }
  0xa8   :  { %v82_v59 = vpop.f32.mrf.mxu0 }
  0xa9   :  { %v83_v60 = vadd.f32 %v82_v59, %v67_v52  ;;  %v96_v61 = vpop.f32.mrf.mxu1 }
  0xaa   :  { %v97_v62 = vadd.f32 %v96_v61, %v68_v53 }
  0xac   :  { %v100_v63 = vpack.c.bf16 %v97_v62, %v83_v60 }
  0xae   :  { %102 = vst [vmem:[%s241_s3 + $0x8] sm:$0xff] %v100_v63 }

// kernel: bert_legal_ca_forward.4
= control target key start
LH: loop header
LB: loop body
LE: loop exit
PB: predicated region body
PF: predicated region fallthrough
CT: control target
= control target key end

     0   :  { %8 = vsyncpa [#allocation3], 0  ;;  %s341_s15 = smov [#allocation2]   ;;  %s342_s17 = smov 128   ;;  %s480_s0 = inlined_call_operand.hbm [shape: f32[192,128], index: 0, kind: input, shape index: {}]   ;;  %s481_s1 = inlined_call_operand.vmem [shape: f32[128,128], index: 1, kind: input, shape index: {}]   ;;  %s482_s2 = inlined_call_operand.vmem [shape: f32[1,128], index: 2, kind: input, shape index: {}]   ;;  %s483_s3 = inlined_call_operand.vmem [shape: bf16[192,128], index: 3, kind: output, shape index: {}]  }
   0x1   :  { %s13_s14 = sshll.u32 %s480_s0, 4  ;;  %s15_s16 = sshll.u32 %s341_s15, 4  ;;  %s14_s14 = int_to_ptr.hbm [resolvable:$true] %s13_s14  ;;  %s16_s16 = int_to_ptr.vmem [resolvable:$true] %s15_s16 }
   0x2   :  { %s343_s18 = smov 8  }
   0x3   :  { %21 = dma.hbm_to_vmem [thread:$0]  %s14_s14, 3072, %s16_s16, [#allocation3], %s342_s17, %s342_s17, %s343_s18  }
   0x4   :  { %339 = dma.done.wait [#allocation3], 3072  }
   0x5   :  { %340 = vsyncadd [#allocation3], 4294964224  ;;  %v80_v0 = vld [vmem:[%s481_s1 + $0x70] sm:$0xff]  ;;  %v81_v1 = vld [vmem:[%s481_s1 + $0x78] sm:$0xff] }
   0x6   :  { %v78_v2 = vld [vmem:[%s481_s1 + $0x60] sm:$0xff]  ;;  %v89_v3 = vpack.c.bf16 %v81_v1, %v80_v0  ;;  %v79_v4 = vld [vmem:[%s481_s1 + $0x68] sm:$0xff]  ;;  %v76_v6 = vld [vmem:[%s481_s1 + $0x50] sm:$0xff] }
   0x7   :  { %v88_v5 = vpack.c.bf16 %v79_v4, %v78_v2  ;;  %v77_v7 = vld [vmem:[%s481_s1 + $0x58] sm:$0xff]  ;;  %v74_v9 = vld [vmem:[%s481_s1 + $0x40] sm:$0xff]  ;;  %v75_v10 = vld [vmem:[%s481_s1 + $0x48] sm:$0xff] }
   0x8   :  { %94 = vmatpush.bf16.msra.mxu0 %v89_v3  ;;  %287 = vmatpush.bf16.msra.mxu1 %v89_v3  ;;  %v87_v8 = vpack.c.bf16 %v77_v7, %v76_v6  ;;  %v86_v11 = vpack.c.bf16 %v75_v10, %v74_v9  ;;  %v72_v12 = vld [vmem:[%s481_s1 + $0x30] sm:$0xff]  ;;  %v73_v13 = vld [vmem:[%s481_s1 + $0x38] sm:$0xff]  ;;  %v70_v15 = vld [vmem:[%s481_s1 + $0x20] sm:$0xff] }
   0x9   :  { %288 = vmatpush.bf16.msra.mxu2 %v89_v3  ;;  %289 = vmatpush.bf16.msra.mxu3 %v89_v3  ;;  %v85_v14 = vpack.c.bf16 %v73_v13, %v72_v12  ;;  %v71_v16 = vld [vmem:[%s481_s1 + $0x28] sm:$0xff]  ;;  %v68_v18 = vld [vmem:[%s481_s1 + $0x10] sm:$0xff]  ;;  %v69_v19 = vld [vmem:[%s481_s1 + $0x18] sm:$0xff] }
   0xa   :  { %v84_v17 = vpack.c.bf16 %v71_v16, %v70_v15  ;;  %v83_v20 = vpack.c.bf16 %v69_v19, %v68_v18  ;;  %v66_v21 = vld [vmem:[%s481_s1] sm:$0xff]  ;;  %v67_v22 = vld [vmem:[%s481_s1 + $0x8] sm:$0xff]  ;;  %v36_v26 = vld [vmem:[#allocation2 + $0x30] sm:$0xff] }
   0xb   :  { %v30_v23 = vld [vmem:[#allocation2] sm:$0xff]  ;;  %v31_v24 = vld [vmem:[#allocation2 + $0x8] sm:$0xff]  ;;  %v82_v25 = vpack.c.bf16 %v67_v22, %v66_v21  ;;  %v37_v27 = vld [vmem:[#allocation2 + $0x38] sm:$0xff] }
   0xc   :  { %95 = vmatpush.bf16.msra.mxu0 %v88_v5  ;;  %290 = vmatpush.bf16.msra.mxu1 %v88_v5  ;;  %v42_v28 = vld [vmem:[#allocation2 + $0x60] sm:$0xff]  ;;  %v43_v29 = vld [vmem:[#allocation2 + $0x68] sm:$0xff]  ;;  %v48_v30 = vld [vmem:[#allocation2 + $0x90] sm:$0xff]  ;;  %v54_v32 = vpack.c.bf16 %v31_v24, %v30_v23  ;;  %v57_v33 = vpack.c.bf16 %v37_v27, %v36_v26 }
   0xd   :  { %291 = vmatpush.bf16.msra.mxu2 %v88_v5  ;;  %292 = vmatpush.bf16.msra.mxu3 %v88_v5  ;;  %v49_v31 = vld [vmem:[#allocation2 + $0x98] sm:$0xff]  ;;  %v60_v34 = vpack.c.bf16 %v43_v29, %v42_v28  ;;  %v32_v36 = vld [vmem:[#allocation2 + $0x10] sm:$0xff]  ;;  %v38_v38 = vld [vmem:[#allocation2 + $0x40] sm:$0xff] }
   0xe   :  { %v63_v35 = vpack.c.bf16 %v49_v31, %v48_v30  ;;  %v33_v37 = vld [vmem:[#allocation2 + $0x18] sm:$0xff]  ;;  %v39_v39 = vld [vmem:[#allocation2 + $0x48] sm:$0xff]  ;;  %v44_v40 = vld [vmem:[#allocation2 + $0x70] sm:$0xff] }
   0xf   :  { %v45_v41 = vld [vmem:[#allocation2 + $0x78] sm:$0xff]  ;;  %v50_v42 = vld [vmem:[#allocation2 + $0xa0] sm:$0xff]  ;;  %v51_v43 = vld [vmem:[#allocation2 + $0xa8] sm:$0xff]  ;;  %v55_v44 = vpack.c.bf16 %v33_v37, %v32_v36  ;;  %v58_v45 = vpack.c.bf16 %v39_v39, %v38_v38 }
  0x10   :  { %96 = vmatpush.bf16.msra.mxu0 %v87_v8  ;;  %293 = vmatpush.bf16.msra.mxu1 %v87_v8  ;;  %v61_v46 = vpack.c.bf16 %v45_v41, %v44_v40  ;;  %v64_v47 = vpack.c.bf16 %v51_v43, %v50_v42  ;;  %v34_v48 = vld [vmem:[#allocation2 + $0x20] sm:$0xff]  ;;  %v35_v49 = vld [vmem:[#allocation2 + $0x28] sm:$0xff]  ;;  %v40_v50 = vld [vmem:[#allocation2 + $0x50] sm:$0xff] }
  0x11   :  { %294 = vmatpush.bf16.msra.mxu2 %v87_v8  ;;  %295 = vmatpush.bf16.msra.mxu3 %v87_v8  ;;  %v41_v51 = vld [vmem:[#allocation2 + $0x58] sm:$0xff]  ;;  %v46_v52 = vld [vmem:[#allocation2 + $0x80] sm:$0xff]  ;;  %v47_v53 = vld [vmem:[#allocation2 + $0x88] sm:$0xff]  ;;  %v56_v56 = vpack.c.bf16 %v35_v49, %v34_v48 }
  0x12   :  { %v52_v54 = vld [vmem:[#allocation2 + $0xb0] sm:$0xff]  ;;  %v53_v55 = vld [vmem:[#allocation2 + $0xb8] sm:$0xff]  ;;  %v59_v57 = vpack.c.bf16 %v41_v51, %v40_v50  ;;  %v62_v58 = vpack.c.bf16 %v47_v53, %v46_v52  ;;  %v418_v62 = vld [vmem:[%s482_s2] ss:$0 sm:$0xff] }
  0x13   :  { %v65_v59 = vpack.c.bf16 %v53_v55, %v52_v54 }
  0x14   :  { %97 = vmatpush.bf16.msra.mxu0 %v86_v11  ;;  %296 = vmatpush.bf16.msra.mxu1 %v86_v11 }
  0x15   :  { %297 = vmatpush.bf16.msra.mxu2 %v86_v11  ;;  %298 = vmatpush.bf16.msra.mxu3 %v86_v11 }
  0x18   :  { %98 = vmatpush.bf16.msra.mxu0 %v85_v14  ;;  %299 = vmatpush.bf16.msra.mxu1 %v85_v14 }
  0x19   :  { %300 = vmatpush.bf16.msra.mxu2 %v85_v14  ;;  %301 = vmatpush.bf16.msra.mxu3 %v85_v14 }
  0x1c   :  { %99 = vmatpush.bf16.msra.mxu0 %v84_v17  ;;  %302 = vmatpush.bf16.msra.mxu1 %v84_v17 }
  0x1d   :  { %303 = vmatpush.bf16.msra.mxu2 %v84_v17  ;;  %304 = vmatpush.bf16.msra.mxu3 %v84_v17 }
  0x20   :  { %100 = vmatpush.bf16.msra.mxu0 %v83_v20  ;;  %305 = vmatpush.bf16.msra.mxu1 %v83_v20 }
  0x21   :  { %306 = vmatpush.bf16.msra.mxu2 %v83_v20  ;;  %307 = vmatpush.bf16.msra.mxu3 %v83_v20 }
  0x24   :  { %101 = vmatpush.bf16.msra.mxu0 %v82_v25  ;;  %308 = vmatpush.bf16.msra.mxu1 %v82_v25 }
  0x25   :  { %309 = vmatpush.bf16.msra.mxu2 %v82_v25  ;;  %310 = vmatpush.bf16.msra.mxu3 %v82_v25 }
  0x27   :  { %102 = vmatmul.bf16.vlgmr.msra.gmra.mxu0 %v54_v32  ;;  %117 = vmatmul.bf16.vlgmr.msra.gmra.mxu1 %v57_v33 }
  0x28   :  { %132 = vmatmul.bf16.vlgmr.msra.gmra.mxu2 %v60_v34  ;;  %147 = vmatmul.bf16.vlgmr.msra.gmra.mxu3 %v63_v35 }
  0x37   :  { %107 = vmatmul.bf16.gmra.mxu0 %v55_v44  ;;  %122 = vmatmul.bf16.gmra.mxu1 %v58_v45 }
  0x38   :  { %137 = vmatmul.bf16.gmra.mxu2 %v61_v46  ;;  %152 = vmatmul.bf16.gmra.mxu3 %v64_v47 }
  0x47   :  { %112 = vmatmul.bf16.gmra.mxu0 %v56_v56  ;;  %127 = vmatmul.bf16.gmra.mxu1 %v59_v57 }
  0x48   :  { %142 = vmatmul.bf16.gmra.mxu2 %v62_v58  ;;  %157 = vmatmul.bf16.gmra.mxu3 %v65_v59 }
  0xa4   :  { %v103_v60 = vpop.f32.mrf.mxu0  ;;  %v118_v61 = vpop.f32.mrf.mxu1 }
  0xa5   :  { %v104_v3 = vadd.f32 %v418_v62, %v103_v60  ;;  %v119_v4 = vadd.f32 %v418_v62, %v118_v61 }
  0xab   :  { %v133_v63 = vpop.f32.mrf.mxu2  ;;  %v148_v0 = vpop.f32.mrf.mxu3 }
  0xac   :  { %v105_v1 = vpop.f32.mrf.mxu0  ;;  %v120_v2 = vpop.f32.mrf.mxu1  ;;  %v134_v11 = vadd.f32 %v418_v62, %v133_v63  ;;  %v149_v12 = vadd.f32 %v418_v62, %v148_v0 }
  0xad   :  { %v106_v5 = vadd.f32 %v418_v62, %v105_v1  ;;  %v121_v6 = vadd.f32 %v418_v62, %v120_v2 }
  0xaf   :  { %v219_v7 = vpack.c.bf16 %v106_v5, %v104_v3  ;;  %v234_v8 = vpack.c.bf16 %v121_v6, %v119_v4 }
  0xb1   :  { %220 = vst [vmem:[%s483_s3] sm:$0xff] %v219_v7  }
  0xb2   :  { %278 = vst [vmem:[%s483_s3 + $0x18] sm:$0xff] %v234_v8  }
  0xb3   :  { %v135_v9 = vpop.f32.mrf.mxu2  ;;  %v150_v10 = vpop.f32.mrf.mxu3 }
  0xb4   :  { %v136_v13 = vadd.f32 %v418_v62, %v135_v9  ;;  %v151_v14 = vadd.f32 %v418_v62, %v150_v10  ;;  %v108_v15 = vpop.f32.mrf.mxu0  ;;  %v123_v16 = vpop.f32.mrf.mxu1 }
  0xb5   :  { %v109_v23 = vadd.f32 %v418_v62, %v108_v15  ;;  %v124_v24 = vadd.f32 %v418_v62, %v123_v16 }
  0xb6   :  { %v249_v17 = vpack.c.bf16 %v136_v13, %v134_v11  ;;  %v264_v18 = vpack.c.bf16 %v151_v14, %v149_v12 }
  0xb8   :  { %281 = vst [vmem:[%s483_s3 + $0x30] sm:$0xff] %v249_v17  }
  0xb9   :  { %284 = vst [vmem:[%s483_s3 + $0x48] sm:$0xff] %v264_v18  }
  0xbb   :  { %v138_v19 = vpop.f32.mrf.mxu2  ;;  %v153_v20 = vpop.f32.mrf.mxu3 }
  0xbc   :  { %v110_v21 = vpop.f32.mrf.mxu0  ;;  %v125_v22 = vpop.f32.mrf.mxu1  ;;  %v139_v31 = vadd.f32 %v418_v62, %v138_v19  ;;  %v154_v32 = vadd.f32 %v418_v62, %v153_v20 }
  0xbd   :  { %v111_v25 = vadd.f32 %v418_v62, %v110_v21  ;;  %v126_v26 = vadd.f32 %v418_v62, %v125_v22 }
  0xbf   :  { %v224_v27 = vpack.c.bf16 %v111_v25, %v109_v23  ;;  %v239_v28 = vpack.c.bf16 %v126_v26, %v124_v24 }
  0xc1   :  { %276 = vst [vmem:[%s483_s3 + $0x8] sm:$0xff] %v224_v27  }
  0xc2   :  { %279 = vst [vmem:[%s483_s3 + $0x20] sm:$0xff] %v239_v28  }
  0xc3   :  { %v140_v29 = vpop.f32.mrf.mxu2  ;;  %v155_v30 = vpop.f32.mrf.mxu3 }
  0xc4   :  { %v141_v33 = vadd.f32 %v418_v62, %v140_v29  ;;  %v156_v34 = vadd.f32 %v418_v62, %v155_v30  ;;  %v113_v35 = vpop.f32.mrf.mxu0  ;;  %v128_v36 = vpop.f32.mrf.mxu1 }
  0xc5   :  { %v114_v43 = vadd.f32 %v418_v62, %v113_v35  ;;  %v129_v44 = vadd.f32 %v418_v62, %v128_v36 }
  0xc6   :  { %v254_v37 = vpack.c.bf16 %v141_v33, %v139_v31  ;;  %v269_v38 = vpack.c.bf16 %v156_v34, %v154_v32 }
  0xc8   :  { %282 = vst [vmem:[%s483_s3 + $0x38] sm:$0xff] %v254_v37  }
  0xc9   :  { %285 = vst [vmem:[%s483_s3 + $0x50] sm:$0xff] %v269_v38  }
  0xcb   :  { %v143_v39 = vpop.f32.mrf.mxu2  ;;  %v158_v40 = vpop.f32.mrf.mxu3 }
  0xcc   :  { %v115_v41 = vpop.f32.mrf.mxu0  ;;  %v130_v42 = vpop.f32.mrf.mxu1  ;;  %v144_v51 = vadd.f32 %v418_v62, %v143_v39  ;;  %v159_v52 = vadd.f32 %v418_v62, %v158_v40 }
  0xcd   :  { %v116_v45 = vadd.f32 %v418_v62, %v115_v41  ;;  %v131_v46 = vadd.f32 %v418_v62, %v130_v42 }
  0xcf   :  { %v229_v47 = vpack.c.bf16 %v116_v45, %v114_v43  ;;  %v244_v48 = vpack.c.bf16 %v131_v46, %v129_v44 }
  0xd1   :  { %277 = vst [vmem:[%s483_s3 + $0x10] sm:$0xff] %v229_v47  }
  0xd2   :  { %280 = vst [vmem:[%s483_s3 + $0x28] sm:$0xff] %v244_v48  }
  0xd3   :  { %v145_v49 = vpop.f32.mrf.mxu2  ;;  %v160_v50 = vpop.f32.mrf.mxu3 }
  0xd4   :  { %v146_v53 = vadd.f32 %v418_v62, %v145_v49  ;;  %v161_v54 = vadd.f32 %v418_v62, %v160_v50 }
  0xd6   :  { %v259_v55 = vpack.c.bf16 %v146_v53, %v144_v51  ;;  %v274_v56 = vpack.c.bf16 %v161_v54, %v159_v52 }
  0xd8   :  { %283 = vst [vmem:[%s483_s3 + $0x40] sm:$0xff] %v259_v55  }
  0xd9   :  { %286 = vst [vmem:[%s483_s3 + $0x58] sm:$0xff] %v274_v56  }
  0xda   :  { %215 = vsyncpa [#allocation3], 1 }

// kernel: bert_legal_ca_forward.7
= control target key start
LH: loop header
LB: loop body
LE: loop exit
PB: predicated region body
PF: predicated region fallthrough
CT: control target
= control target key end

     0   :  { %13 = vsyncpa [#allocation3], 0  ;;  %s318_s0 = inlined_call_operand.vmem [shape: f32[2,3,16], index: 0, kind: input, shape index: {}]   ;;  %s319_s1 = inlined_call_operand.vmem [shape: f32[16,12], index: 1, kind: input, shape index: {}]   ;;  %s320_s2 = inlined_call_operand.vmem [shape: f32[1,12], index: 2, kind: input, shape index: {}]   ;;  %s321_s3 = inlined_call_operand.vmem [shape: f32[16,11], index: 3, kind: input, shape index: {}]   ;;  %s322_s4 = inlined_call_operand.vmem [shape: f32[1,11], index: 4, kind: input, shape index: {}]   ;;  %s323_s5 = inlined_call_operand.hbm [shape: f32[2,16], index: 5, kind: output, shape index: {0}]   ;;  %s324_s6 = inlined_call_operand.hbm [shape: f32[2,12], index: 6, kind: output, shape index: {1}]   ;;  %s325_s7 = inlined_call_operand.hbm [shape: f32[2,11], index: 7, kind: output, shape index: {2}]  }
   0x1   :  { %v38_v0 = vld [vmem:[%s319_s1 + $0x8] sm:$0xff]  ;;  %v37_v2 = vld [vmem:[%s319_s1] sm:$0xff] }
   0x2   :  { %v73_v1 = vld [vmem:[%s321_s3 + $0x8] sm:$0xff]  ;;  %64 = vmatpush.msra.mxu0 %v38_v0  ;;  %v25_v3 = vld [vmem:[%s318_s0] sm:$0x7]  ;;  %v26_v4 = vld [vmem:[%s318_s0 + $0x4] sm:$0x7] }
   0x3   :  { %97 = vmatpush.msra.mxu1 %v73_v1  ;;  %v72_v5 = vld [vmem:[%s321_s3] sm:$0xff]  ;;  %159 = vtanh.f32 %v25_v3 }
   0x4   :  { %65 = vmatpush.msra.mxu0 %v37_v2  ;;  %161 = vtanh.f32 %v26_v4 }
   0x5   :  { %98 = vmatpush.msra.mxu1 %v72_v5 }
   0x6   :  { %14 = vsyncpa [#allocation5], 0  ;;  %vm30_vm0 = vcmask 1041409   ;;  %vm47_vm1 = vcmask 130048   ;;  %s239_s0 = smov [#allocation2]   ;;  %s112_s14 = sshll.u32 %s323_s5, 4  ;;  %s113_s14 = int_to_ptr.hbm [resolvable:$true] %s112_s14 }
   0x7   :  { %s110_s1 = sshll.u32 %s239_s0, 4  ;;  %v29_v13 = vrot.slane %v26_v4, 7  ;;  %vm33_vm2 = vcmask 123904   ;;  %v157_v15 = vld [vmem:[%s320_s2] ss:$0 sm:$0xff]  ;;  %s240_s19 = smov [#allocation4]   ;;  %s111_s1 = int_to_ptr.vmem [resolvable:$true] %s110_s1 }
   0x8   :  { %v158_v16 = vld [vmem:[%s322_s4] ss:$0 sm:$0xff]  ;;  %s121_s20 = sshll.u32 %s240_s19, 4  ;;  %s123_s22 = sshll.u32 %s324_s6, 4  ;;  %vm70_vm3 = vcmask 91136   ;;  %vm103_vm4 = vcmask 82944   ;;  %s122_s20 = int_to_ptr.vmem [resolvable:$true] %s121_s20  ;;  %s124_s22 = int_to_ptr.hbm [resolvable:$true] %s123_s22 }
   0x9   :  { %v160_v6 = vpop.eup %159  ;;  %v31_v14 = vsel %vm30_vm0, %v29_v13, %v25_v3  ;;  %s241_s23 = smov [#allocation6]   ;;  %s134_s27 = sshll.u32 %s325_s7, 4  ;;  %s135_s27 = int_to_ptr.hbm [resolvable:$true] %s134_s27 }
   0xa   :  { %v162_v7 = vpop.eup %161  ;;  %v45_v8 = vrot.slane %v160_v6, 1  ;;  %v78_v9 = vrot.slane %v160_v6, 2  ;;  %34 = vst.msk [vmem:[#allocation2] sm:$0x3] %vm33_vm2, %v31_v14  ;;  %s132_s24 = sshll.u32 %s241_s23, 4  ;;  %s133_s24 = int_to_ptr.vmem [resolvable:$true] %s132_s24 }
   0xb   :  { %v79_v10 = vrot.slane %v162_v7, 1  ;;  %115 = dma.vmem_to_hbm [thread:$0]  %s111_s1, 32, %s113_s14, [#allocation3]  }
   0xc   :  { %v46_v11 = vsel %vm30_vm0, %v162_v7, %v45_v8 }
   0xd   :  { %152 = vmatmul.msk.f32.vlgmr.msra.gmra.mxu0 %vm47_vm1, %v46_v11  ;;  %v80_v12 = vsel %vm30_vm0, %v79_v10, %v78_v9 }
   0xe   :  { %153 = vmatmul.msk.f32.vlgmr.msra.gmra.mxu1 %vm47_vm1, %v80_v12 }
  0x8a   :  { %v67_v17 = vpop.f32.mrf.mxu0 }
  0x8b   :  { %v68_v18 = vadd.f32 %v157_v15, %v67_v17  ;;  %v100_v19 = vpop.f32.mrf.mxu1 }
  0x8c   :  { %v101_v20 = vadd.f32 %v158_v16, %v100_v19 }
  0x8d   :  { %71 = vst.msk [vmem:[#allocation4] sm:$0x3] %vm70_vm3, %v68_v18 }
  0x8e   :  { %104 = vst.msk [vmem:[#allocation6] sm:$0x3] %vm103_vm4, %v101_v20  ;;  %126 = dma.vmem_to_hbm [thread:$0]  %s122_s20, 32, %s124_s22, [#allocation5]  }
  0x8f   :  { %137 = dma.vmem_to_hbm [thread:$0]  %s133_s24, 32, %s135_s27, [#allocation5]  }
  0x90   :  { %235 = dma.done.wait [#allocation3], 32  }
  0x91   :  { %236 = vsyncadd [#allocation3], 4294967264 }
  0x92   :  { %237 = dma.done.wait [#allocation5], 64  }
  0x93   :  { %238 = vsyncadd [#allocation5], 4294967232 }
  0x94   :  { %150 = vsyncpa [#allocation3], 1 }
  0x95   :  { %151 = vsyncpa [#allocation5], 1 }

// kernel: bert_legal_ca_forward.6
= control target key start
LH: loop header
LB: loop body
LE: loop exit
PB: predicated region body
PF: predicated region fallthrough
CT: control target
= control target key end

     0   :  { %s1392_s24 = smov 0   ;;  %s1394_s25 = smov 0   ;;  %s1747_s0 = inlined_call_operand.vmem [shape: bf16[16,16,128], index: 0, kind: input, shape index: {}]   ;;  %s1748_s1 = inlined_call_operand.vmem [shape: bf16[2,8,256], index: 1, kind: input, shape index: {}]   ;;  %s1749_s2 = inlined_call_operand.vmem [shape: f32[2,1,8], index: 2, kind: input, shape index: {}]   ;;  %s1750_s3 = inlined_call_operand.vmem [shape: f32[128,3], index: 3, kind: input, shape index: {}]   ;;  %s1751_s4 = inlined_call_operand.vmem [shape: f32[1,3], index: 4, kind: input, shape index: {}]   ;;  %s1752_s5 = inlined_call_operand.vmem [shape: f32[16,3], index: 5, kind: input, shape index: {}]   ;;  %s1753_s6 = inlined_call_operand.vmem [shape: f32[1,3], index: 6, kind: input, shape index: {}]   ;;  %s1754_s7 = inlined_call_operand.vmem [shape: f32[2,2,3,8], index: 7, kind: output, shape index: {}]  }
   0x1   :  { %s1396_s26 = smov 0   ;;  %s1398_s27 = smov 0  }
   0x2   :  { %s1400_s28 = smov 0  }
   0x3 LB: > { %s26_s29 = sadd.s32 1, %s1342_s26  ;;  %s29_s30 = sadd.s32 1, %s1346_s27  ;;  %s1350_s28 = sphi %s1400_s28, %s17_s28   ;;  %s1346_s27 = sphi %s1398_s27, %s1758_s27   ;;  %s1342_s26 = sphi %s1396_s26, %s1757_s26   ;;  %s1338_s25 = sphi %s1394_s25, %s1756_s25   ;;  %s1334_s24 = sphi %s1392_s24, %s1755_s24  }
   0x4   : > { %p27_p0 = scmp.ge.s32.totalorder %s26_s29, 2  ;;  %p1097_p1 = scmp.ge.s32.totalorder %s1350_s28, 1 }
   0x5   : > { %p271_p2 = scmp.lt.s32.totalorder %s1350_s28, 5 }
   0x6   : > { %s1760_s29 = smov (%p27_p0, %s26_s29), 0  ;;  %s1762_s30 = smov (!%p27_p0, %s29_s30), %s1346_s27 }
   0x7   : > { %p272_p3 = pnand %p1097_p1, %p271_p2  ;;  %p31_p4 = scmp.ge.s32.totalorder %s1762_s30, 2 }
   0x8   : > { %p322_p5 = scmp.lt.s32.totalorder (!%p272_p3), %s1334_s24, 1  ;;  %s1098_s8 = sshll.u32 (!%p272_p3), %s1338_s25, 3 }
   0x9   : > { %s1764_s30 = smov (%p31_p4, %s1762_s30), 0  ;;  %275 = sbr.rel (%p272_p3) target bundleno = 1045 (0x415), region = 48 }
   0xa   : > { %p316_p6 = scmp.lt.s32.totalorder (!%p272_p3), %s1098_s8, 15  ;;  %p330_p7 = scmp.lt.s32.totalorder (!%p272_p3), %s1338_s25, 1 }
   0xe   : > { %s1766_s24 = smov (!%p322_p5, %s1334_s24), 1  ;;  %s1768_s8 = smov (!%p316_p6, %s1098_s8), 15  ;;  %vm459_vm0 = vcmask 64512   ;;  %vm671_vm1 = vcmask 1043456   ;;  %vm843_vm2 = vcmask 23552   ;;  %vm937_vm3 = vcmask 1041409  }
   0xf   : > { %s1148_s9 = sshll.u32 %s1766_s24, 3  ;;  %s1147_s13 = sshll.u32 %s1768_s8, 3  ;;  %vm940_vm4 = vcmask 1042434   ;;  %vm943_vm5 = vcmask 1043459   ;;  %vm946_vm6 = vcmask 1044484   ;;  %vm949_vm7 = vcmask 1045509  }
  0x10   : > { %s326_s12 = scalar_lea.vmem %s1748_s1, %s1148_s9  ;;  %s320_s16 = scalar_lea.vmem %s1747_s0, %s1147_s13  ;;  %vm952_vm8 = vcmask 1046534   ;;  %vm955_vm9 = vcmask 1047559   ;;  %vm990_vm10 = vcmask 59392  }
  0x11   : > { %v1431_v0 = vld [vmem:[%s326_s12] sm:$0xff]  ;;  %v1150_v2 = vld [vmem:[%s320_s16 + $0x8] sm:$0xff]  ;;  %v1151_v3 = vld [vmem:[%s320_s16 + $0x10] sm:$0xff]  ;;  %s329_s19 = scalar_lea.vmem %s1749_s2, %s1766_s24  ;;  %s1770_s25 = smov (!%p330_p7, %s1338_s25), 1 }
  0x12   : > { %417 = vmatpush.bf16.xpose.msra.mxu0 %v1431_v0  ;;  %v1149_v1 = vld [vmem:[%s320_s16] sm:$0xff]  ;;  %v1152_v4 = vld [vmem:[%s320_s16 + $0x18] sm:$0xff]  ;;  %v1154_v6 = vld [vmem:[%s320_s16 + $0x28] sm:$0xff]  ;;  %s1103_s12 = sshll.u32 %s1770_s25, 1 }
  0x13   : > { %v1153_v5 = vld [vmem:[%s320_s16 + $0x20] sm:$0xff]  ;;  %v1155_v10 = vld [vmem:[%s320_s16 + $0x30] sm:$0xff]  ;;  %v1156_v17 = vld [vmem:[%s320_s16 + $0x38] sm:$0xff]  ;;  %s335_s13 = sadd.s32 %s1103_s12, %s1766_s24 }
  0x14   : > { %v356_v7 = vld [vmem:[%s329_s19] sm:$0x1]  ;;  %s1104_s14 = sshll.u32 %s335_s13, 2 }
  0x15   : > { %v357_v8 = vsub.f32 1.0, %v356_v7  ;;  %s337_s17 = scalar_lea.vmem %s1754_s7, %s1104_s14 }
  0x17   : > { %v358_v9 = vmul.f32 -10000.0, %v357_v8 }
  0x19   : > { %418 = vmatmul.bf16.vlgmr.msra.gmra.mxu0 %v1149_v1  ;;  %v1441_v11 = vperm.slane %v358_v9, 0 }
  0x29   : > { %423 = vmatmul.bf16.gmra.mxu0 %v1150_v2 }
  0x39   : > { %428 = vmatmul.bf16.gmra.mxu0 %v1151_v3 }
  0x49   : > { %433 = vmatmul.bf16.gmra.mxu0 %v1152_v4 }
  0x59   : > { %438 = vmatmul.bf16.gmra.mxu0 %v1153_v5 }
  0x69   : > { %443 = vmatmul.bf16.gmra.mxu0 %v1154_v6 }
  0x79   : > { %448 = vmatmul.bf16.gmra.mxu0 %v1155_v10 }
  0x89   : > { %453 = vmatmul.bf16.gmra.mxu0 %v1156_v17 }
  0x96   : > { %v419_v12 = vpop.f32.mrf.mxu0 }
  0x97   : > { %v420_v13 = vadd.f32 %v419_v12, %v1441_v11 }
  0x99   : > { %v460_v14 = vsel %vm459_vm0, %v420_v13, -inf }
  0x9a   : > { %461 = vmax.xlane.f32.xlu0 %v460_v14 }
  0x9e   : > { %v421_v15 = vpop.f32.mrf.mxu0 }
  0x9f   : > { %v422_v16 = vadd.f32 %v421_v15, %v1441_v11 }
  0xa1   : > { %v463_v18 = vsel %vm459_vm0, %v422_v16, -inf }
  0xa2   : > { %464 = vmax.xlane.f32.xlu0 %v463_v18 }
  0xa6   : > { %v424_v19 = vpop.f32.mrf.mxu0 }
  0xa7   : > { %v425_v20 = vadd.f32 %v424_v19, %v1441_v11 }
  0xa9   : > { %v466_v21 = vsel %vm459_vm0, %v425_v20, -inf }
  0xaa   : > { %467 = vmax.xlane.f32.xlu1 %v466_v21 }
  0xae   : > { %v426_v22 = vpop.f32.mrf.mxu0 }
  0xaf   : > { %v427_v23 = vadd.f32 %v426_v22, %v1441_v11 }
  0xb1   : > { %v469_v24 = vsel %vm459_vm0, %v427_v23, -inf }
  0xb2   : > { %470 = vmax.xlane.f32.xlu1 %v469_v24 }
  0xb6   : > { %v429_v25 = vpop.f32.mrf.mxu0 }
  0xb7   : > { %v430_v26 = vadd.f32 %v429_v25, %v1441_v11 }
  0xb9   : > { %v472_v27 = vsel %vm459_vm0, %v430_v26, -inf }
  0xba   : > { %473 = vmax.xlane.f32.xlu2 %v472_v27 }
  0xbe   : > { %v431_v28 = vpop.f32.mrf.mxu0 }
  0xbf   : > { %v1454_v29 = vadd.f32 %v431_v28, %v1441_v11 }
  0xc1   : > { %v475_v30 = vsel %vm459_vm0, %v1454_v29, -inf }
  0xc2   : > { %476 = vmax.xlane.f32.xlu2 %v475_v30 }
  0xc6   : > { %v434_v31 = vpop.f32.mrf.mxu0 }
  0xc7   : > { %v1459_v32 = vadd.f32 %v434_v31, %v1441_v11 }
  0xc9   : > { %v478_v33 = vsel %vm459_vm0, %v1459_v32, -inf }
  0xca   : > { %479 = vmax.xlane.f32.xlu0 %v478_v33 }
  0xce   : > { %v436_v34 = vpop.f32.mrf.mxu0 }
  0xcf   : > { %v1464_v35 = vadd.f32 %v436_v34, %v1441_v11 }
  0xd1   : > { %v481_v36 = vsel %vm459_vm0, %v1464_v35, -inf }
  0xd2   : > { %482 = vmax.xlane.f32.xlu1 %v481_v36 }
  0xd6   : > { %v439_v37 = vpop.f32.mrf.mxu0 }
  0xd7   : > { %v1469_v38 = vadd.f32 %v439_v37, %v1441_v11 }
  0xd9   : > { %v484_v39 = vsel %vm459_vm0, %v1469_v38, -inf }
  0xda   : > { %485 = vmax.xlane.f32.xlu1 %v484_v39 }
  0xde   : > { %v441_v42 = vpop.f32.mrf.mxu0 }
  0xdf   : > { %v1478_v50 = vadd.f32 %v441_v42, %v1441_v11 }
  0xe1   : > { %v487_v55 = vsel %vm459_vm0, %v1478_v50, -inf }
  0xe6   : > { %v444_v48 = vpop.f32.mrf.mxu0 }
  0xe7   : > { %v1487_v58 = vadd.f32 %v444_v48, %v1441_v11 }
  0xe9   : > { %v490_v61 = vsel %vm459_vm0, %v1487_v58, -inf }
  0xee   : > { %v446_v57 = vpop.f32.mrf.mxu0 }
  0xef   : > { %v1496_v3 = vadd.f32 %v446_v57, %v1441_v11 }
  0xf1   : > { %v493_v9 = vsel %vm459_vm0, %v1496_v3, -inf }
  0xf6   : > { %v449_v2 = vpop.f32.mrf.mxu0 }
  0xf7   : > { %v1505_v10 = vadd.f32 %v449_v2, %v1441_v11 }
  0xf9   : > { %v496_v15 = vsel %vm459_vm0, %v1505_v10, -inf }
  0xfe   : > { %v451_v14 = vpop.f32.mrf.mxu0 }
  0xff   : > { %v1515_v19 = vadd.f32 %v451_v14, %v1441_v11 }
 0x101   : > { %v499_v25 = vsel %vm459_vm0, %v1515_v19, -inf }
 0x106   : > { %v454_v24 = vpop.f32.mrf.mxu0 }
 0x107   : > { %v1525_v27 = vadd.f32 %v454_v24, %v1441_v11 }
 0x109   : > { %v502_v30 = vsel %vm459_vm0, %v1525_v27, -inf }
 0x10d   : > { %v462_v40 = vpop.xlane.xlu0 %461 }
 0x10e   : > { %v508_v41 = vsub.f32 %v420_v13, %v462_v40  ;;  %v456_v34 = vpop.f32.mrf.mxu0 }
 0x10f   : > { %v1535_v36 = vadd.f32 %v456_v34, %v1441_v11  ;;  %v733_v34 = vld [vmem:[%s1750_s3 + $0x48] sm:$0xff] }
 0x110   : > { %v524_v43 = vmul.f32 1.442695, %v508_v41 }
 0x111   : > { %v505_v42 = vsel %vm459_vm0, %v1535_v36, -inf }
 0x112   : > { %1216 = vpow2.f32 %v524_v43 }
 0x115   : > { %v465_v44 = vpop.xlane.xlu0 %464 }
 0x116   : > { %v509_v45 = vsub.f32 %v422_v16, %v465_v44 }
 0x118   : > { %v1473_v46 = vpop.eup %1216  ;;  %v526_v47 = vmul.f32 1.442695, %v509_v45 }
 0x119   : > { %v556_v49 = vsel %vm459_vm0, %v1473_v46, 0.0 }
 0x11a   : > { %1218 = vpow2.f32 %v526_v47  ;;  %557 = vadd.xlane.f32.xlu2 %v556_v49 }
 0x11d   : > { %v468_v51 = vpop.xlane.xlu1 %467 }
 0x11e   : > { %v510_v52 = vsub.f32 %v425_v20, %v468_v51 }
 0x120   : > { %v1480_v53 = vpop.eup %1218  ;;  %v528_v54 = vmul.f32 1.442695, %v510_v52 }
 0x121   : > { %v559_v56 = vsel %vm459_vm0, %v1480_v53, 0.0 }
 0x122   : > { %1220 = vpow2.f32 %v528_v54  ;;  %488 = vmax.xlane.f32.xlu2 %v487_v55  ;;  %560 = vadd.xlane.f32.xlu0 %v559_v56 }
 0x125   : > { %v471_v59 = vpop.xlane.xlu1 %470 }
 0x126   : > { %v511_v60 = vsub.f32 %v427_v23, %v471_v59 }
 0x128   : > { %v1491_v62 = vpop.eup %1220  ;;  %v530_v63 = vmul.f32 1.442695, %v511_v60 }
 0x129   : > { %v562_v1 = vsel %vm459_vm0, %v1491_v62, 0.0 }
 0x12a   : > { %1222 = vpow2.f32 %v530_v63  ;;  %491 = vmax.xlane.f32.xlu2 %v490_v61  ;;  %563 = vadd.xlane.f32.xlu0 %v562_v1 }
 0x12d   : > { %v474_v4 = vpop.xlane.xlu2 %473 }
 0x12e   : > { %v512_v5 = vsub.f32 %v430_v26, %v474_v4 }
 0x130   : > { %v1498_v6 = vpop.eup %1222  ;;  %v532_v7 = vmul.f32 1.442695, %v512_v5 }
 0x131   : > { %v565_v8 = vsel %vm459_vm0, %v1498_v6, 0.0 }
 0x132   : > { %1224 = vpow2.f32 %v532_v7  ;;  %566 = vadd.xlane.f32.xlu1 %v565_v8  ;;  %494 = vmax.xlane.f32.xlu0 %v493_v9 }
 0x135   : > { %v477_v12 = vpop.xlane.xlu2 %476 }
 0x136   : > { %v513_v13 = vsub.f32 %v1454_v29, %v477_v12 }
 0x138   : > { %v1510_v16 = vpop.eup %1224  ;;  %v534_v17 = vmul.f32 1.442695, %v513_v13 }
 0x139   : > { %v568_v18 = vsel %vm459_vm0, %v1510_v16, 0.0 }
 0x13a   : > { %1226 = vpow2.f32 %v534_v17  ;;  %569 = vadd.xlane.f32.xlu1 %v568_v18  ;;  %497 = vmax.xlane.f32.xlu0 %v496_v15 }
 0x13d   : > { %v480_v20 = vpop.xlane.xlu0 %479 }
 0x13e   : > { %v514_v21 = vsub.f32 %v1459_v32, %v480_v20 }
 0x140   : > { %v1518_v22 = vpop.eup %1226  ;;  %v536_v23 = vmul.f32 1.442695, %v514_v21  ;;  %v739_v21 = vld [vmem:[%s1750_s3 + $0x78] sm:$0xff] }
 0x141   : > { %v571_v26 = vsel %vm459_vm0, %v1518_v22, 0.0  ;;  %744 = vmatpush.msra.mxu2 %v739_v21  ;;  %1157 = vmatpush.msra.mxu3 %v739_v21 }
 0x142   : > { %1228 = vpow2.f32 %v536_v23  ;;  %500 = vmax.xlane.f32.xlu1 %v499_v25  ;;  %572 = vadd.xlane.f32.xlu2 %v571_v26  ;;  %v736_v25 = vld [vmem:[%s1750_s3 + $0x60] sm:$0xff] }
 0x145   : > { %v483_v28 = vpop.xlane.xlu1 %482 }
 0x146   : > { %v515_v29 = vsub.f32 %v1464_v35, %v483_v28 }
 0x148   : > { %v1530_v31 = vpop.eup %1228  ;;  %v538_v32 = vmul.f32 1.442695, %v515_v29  ;;  %v735_v29 = vld [vmem:[%s1750_s3 + $0x58] sm:$0xff] }
 0x149   : > { %v574_v33 = vsel %vm459_vm0, %v1530_v31, 0.0 }
 0x14a   : > { %1230 = vpow2.f32 %v538_v32  ;;  %503 = vmax.xlane.f32.xlu1 %v502_v30  ;;  %575 = vadd.xlane.f32.xlu2 %v574_v33  ;;  %v734_v32 = vld [vmem:[%s1750_s3 + $0x50] sm:$0xff] }
 0x14d   : > { %v486_v37 = vpop.xlane.xlu1 %485 }
 0x14e   : > { %v516_v39 = vsub.f32 %v1469_v38, %v486_v37  ;;  %v645_v38 = vunpack.c.h.b16 %v1431_v0 }
 0x150   : > { %v1538_v35 = vpop.eup %1230  ;;  %v540_v40 = vmul.f32 1.442695, %v516_v39  ;;  %v646_v44 = vpack.c.b16 %v645_v38, %v645_v38 }
 0x151   : > { %v577_v41 = vsel %vm459_vm0, %v1538_v35, 0.0 }
 0x152   : > { %1232 = vpow2.f32 %v540_v40  ;;  %578 = vadd.xlane.f32.xlu0 %v577_v41  ;;  %506 = vmax.xlane.f32.xlu2 %v505_v42  ;;  %v673_v45 = vsel %vm671_vm1, %v646_v44, 0 }
 0x153   : > { %682 = vmatpush.bf16.msra.mxu1 %v673_v45 }
 0x158   : > { %v1544_v43 = vpop.eup %1232 }
 0x159   : > { %v580_v11 = vsel %vm459_vm0, %v1544_v43, 0.0 }
 0x15a   : > { %581 = vadd.xlane.f32.xlu0 %v580_v11  ;;  %v732_v11 = vld [vmem:[%s1750_s3 + $0x40] sm:$0xff] }
 0x18d   : > { %v558_v47 = vpop.xlane.xlu2 %557 }
 0x18e   : > { %1234 = vrcp.f32 %v558_v47  ;;  %v729_v47 = vld [vmem:[%s1750_s3 + $0x28] sm:$0xff] }
 0x194   : > { %v1235_v54 = vpop.eup %1234 }
 0x195   : > { %v489_v48 = vpop.xlane.xlu2 %488  ;;  %v561_v49 = vpop.xlane.xlu0 %560  ;;  %v620_v59 = vmul.f32 %v1235_v54, %v1473_v46 }
 0x196   : > { %v517_v51 = vsub.f32 %v1478_v50, %v489_v48  ;;  %1236 = vrcp.f32 %v561_v49 }
 0x198   : > { %v542_v52 = vmul.f32 1.442695, %v517_v51 }
 0x19a   : > { %1238 = vpow2.f32 %v542_v52 }
 0x19c   : > { %v1237_v55 = vpop.eup %1236 }
 0x19d   : > { %v492_v56 = vpop.xlane.xlu2 %491  ;;  %v564_v57 = vpop.xlane.xlu0 %563  ;;  %v621_v0 = vmul.f32 %v1237_v55, %v1480_v53 }
 0x19e   : > { %v518_v60 = vsub.f32 %v1487_v58, %v492_v56 }
 0x19f   : > { %v636_v61 = vpack.c.bf16 %v621_v0, %v620_v59 }
 0x1a0   : > { %v1553_v63 = vpop.eup %1238  ;;  %v544_v1 = vmul.f32 1.442695, %v518_v60 }
 0x1a1   : > { %1137 = vmatmul.msk.bf16.vlgmr.msra.gmra.mxu1 %vm459_vm0, %v636_v61  ;;  %v583_v50 = vsel %vm459_vm0, %v1553_v63, 0.0 }
 0x1a2   : > { %1240 = vpow2.f32 %v544_v1  ;;  %584 = vadd.xlane.f32.xlu1 %v583_v50  ;;  %v728_v1 = vld [vmem:[%s1750_s3 + $0x20] sm:$0xff]  ;;  %v725_v50 = vld [vmem:[%s1750_s3 + $0x8] sm:$0xff] }
 0x1a3   : > { %1242 = vrcp.f32 %v564_v57 }
 0x1a5   : > { %v567_v2 = vpop.xlane.xlu1 %566  ;;  %v495_v4 = vpop.xlane.xlu0 %494 }
 0x1a6   : > { %1244 = vrcp.f32 %v567_v2  ;;  %v519_v46 = vsub.f32 %v1496_v3, %v495_v4  ;;  %v724_v2 = vld [vmem:[%s1750_s3] sm:$0xff] }
 0x1a8   : > { %v1559_v53 = vpop.eup %1240  ;;  %v546_v58 = vmul.f32 1.442695, %v519_v46 }
 0x1a9   : > { %v586_v5 = vsel %vm459_vm0, %v1559_v53, 0.0  ;;  %v1243_v7 = vpop.eup %1242 }
 0x1aa   : > { %1246 = vpow2.f32 %v546_v58  ;;  %587 = vadd.xlane.f32.xlu2 %v586_v5  ;;  %v622_v13 = vmul.f32 %v1243_v7, %v1491_v62  ;;  %v738_v62 = vld [vmem:[%s1750_s3 + $0x70] sm:$0xff] }
 0x1ab   : > { %745 = vmatpush.msra.mxu2 %v738_v62  ;;  %1158 = vmatpush.msra.mxu3 %v738_v62 }
 0x1ac   : > { %v1245_v8 = vpop.eup %1244 }
 0x1ad   : > { %v570_v9 = vpop.xlane.xlu1 %569  ;;  %v498_v12 = vpop.xlane.xlu0 %497  ;;  %v623_v14 = vmul.f32 %v1245_v8, %v1498_v6  ;;  %v737_v6 = vld [vmem:[%s1750_s3 + $0x68] sm:$0xff] }
 0x1ae   : > { %v520_v15 = vsub.f32 %v1505_v10, %v498_v12  ;;  %746 = vmatpush.msra.mxu2 %v737_v6  ;;  %1159 = vmatpush.msra.mxu3 %v737_v6 }
 0x1af   : > { %v637_v17 = vpack.c.bf16 %v623_v14, %v622_v13 }
 0x1b0   : > { %v1566_v3 = vpop.eup %1246  ;;  %v548_v18 = vmul.f32 1.442695, %v520_v15  ;;  %747 = vmatpush.msra.mxu2 %v736_v25  ;;  %1160 = vmatpush.msra.mxu3 %v736_v25 }
 0x1b1   : > { %1138 = vmatmul.msk.bf16.gmra.mxu1 %vm459_vm0, %v637_v17  ;;  %v589_v20 = vsel %vm459_vm0, %v1566_v3, 0.0 }
 0x1b2   : > { %1248 = vpow2.f32 %v548_v18  ;;  %590 = vadd.xlane.f32.xlu0 %v589_v20  ;;  %748 = vmatpush.msra.mxu2 %v735_v29 }
 0x1b3   : > { %1250 = vrcp.f32 %v570_v9  ;;  %1161 = vmatpush.msra.mxu3 %v735_v29 }
 0x1b4   : > { %749 = vmatpush.msra.mxu2 %v734_v32 }
 0x1b5   : > { %v501_v10 = vpop.xlane.xlu1 %500  ;;  %v573_v23 = vpop.xlane.xlu2 %572  ;;  %1162 = vmatpush.msra.mxu3 %v734_v32 }
 0x1b6   : > { %v521_v24 = vsub.f32 %v1515_v19, %v501_v10  ;;  %1252 = vrcp.f32 %v573_v23  ;;  %750 = vmatpush.msra.mxu2 %v733_v34 }
 0x1b7   : > { %1163 = vmatpush.msra.mxu3 %v733_v34 }
 0x1b8   : > { %v1584_v26 = vpop.eup %1248  ;;  %v550_v28 = vmul.f32 1.442695, %v521_v24  ;;  %751 = vmatpush.msra.mxu2 %v732_v11 }
 0x1b9   : > { %v592_v30 = vsel %vm459_vm0, %v1584_v26, 0.0  ;;  %v1251_v19 = vpop.eup %1250  ;;  %1164 = vmatpush.msra.mxu3 %v732_v11 }
 0x1ba   : > { %1254 = vpow2.f32 %v550_v28  ;;  %593 = vadd.xlane.f32.xlu1 %v592_v30  ;;  %v624_v40 = vmul.f32 %v1251_v19, %v1510_v16  ;;  %v731_v16 = vld [vmem:[%s1750_s3 + $0x38] sm:$0xff] }
 0x1bb   : > { %752 = vmatpush.msra.mxu2 %v731_v16  ;;  %1165 = vmatpush.msra.mxu3 %v731_v16 }
 0x1bc   : > { %v1253_v33 = vpop.eup %1252 }
 0x1bd   : > { %v504_v37 = vpop.xlane.xlu1 %503  ;;  %v576_v39 = vpop.xlane.xlu2 %575  ;;  %v625_v41 = vmul.f32 %v1253_v33, %v1518_v22 }
 0x1be   : > { %v522_v42 = vsub.f32 %v1525_v27, %v504_v37  ;;  %v730_v27 = vld [vmem:[%s1750_s3 + $0x30] sm:$0xff] }
 0x1bf   : > { %v638_v38 = vpack.c.bf16 %v625_v41, %v624_v40  ;;  %753 = vmatpush.msra.mxu2 %v730_v27  ;;  %1166 = vmatpush.msra.mxu3 %v730_v27 }
 0x1c0   : > { %v1603_v44 = vpop.eup %1254  ;;  %v552_v45 = vmul.f32 1.442695, %v522_v42  ;;  %v1659_v42 = vld [vmem:[%s1751_s4] ss:$0 sm:$0xff] }
 0x1c1   : > { %1139 = vmatmul.msk.bf16.gmra.mxu1 %vm459_vm0, %v638_v38  ;;  %v595_v22 = vsel %vm459_vm0, %v1603_v44, 0.0  ;;  %754 = vmatpush.msra.mxu2 %v729_v47 }
 0x1c2   : > { %1256 = vpow2.f32 %v552_v45  ;;  %596 = vadd.xlane.f32.xlu2 %v595_v22  ;;  %1167 = vmatpush.msra.mxu3 %v729_v47  ;;  %v1666_v47 = vld [vmem:[%s1752_s5] sm:$0xff] }
 0x1c3   : > { %1258 = vrcp.f32 %v576_v39  ;;  %755 = vmatpush.msra.mxu2 %v728_v1 }
 0x1c4   : > { %1168 = vmatpush.msra.mxu3 %v728_v1 }
 0x1c5   : > { %v507_v48 = vpop.xlane.xlu2 %506  ;;  %v579_v49 = vpop.xlane.xlu0 %578 }
 0x1c6   : > { %v523_v51 = vsub.f32 %v1535_v36, %v507_v48  ;;  %1260 = vrcp.f32 %v579_v49  ;;  %v1671_v48 = vld [vmem:[%s1752_s5 + $0x8] sm:$0xff] }
 0x1c8   : > { %v1618_v52 = vpop.eup %1256  ;;  %v554_v54 = vmul.f32 1.442695, %v523_v51 }
 0x1c9   : > { %v598_v55 = vsel %vm459_vm0, %v1618_v52, 0.0  ;;  %v1259_v56 = vpop.eup %1258 }
 0x1ca   : > { %1262 = vpow2.f32 %v554_v54  ;;  %599 = vadd.xlane.f32.xlu0 %v598_v55  ;;  %v626_v59 = vmul.f32 %v1259_v56, %v1530_v31  ;;  %v727_v31 = vld [vmem:[%s1750_s3 + $0x18] sm:$0xff] }
 0x1cb   : > { %756 = vmatpush.msra.mxu2 %v727_v31  ;;  %1169 = vmatpush.msra.mxu3 %v727_v31 }
 0x1cc   : > { %v1261_v57 = vpop.eup %1260 }
 0x1cd   : > { %v627_v0 = vmul.f32 %v1261_v57, %v1538_v35  ;;  %v726_v35 = vld [vmem:[%s1750_s3 + $0x10] sm:$0xff]  ;;  %v582_v4 = vpop.xlane.xlu0 %581 }
 0x1ce   : > { %757 = vmatpush.msra.mxu2 %v726_v35  ;;  %1170 = vmatpush.msra.mxu3 %v726_v35  ;;  %1264 = vrcp.f32 %v582_v4 }
 0x1cf   : > { %v639_v60 = vpack.c.bf16 %v627_v0, %v626_v59 }
 0x1d0   : > { %v1624_v36 = vpop.eup %1262  ;;  %758 = vmatpush.msra.mxu2 %v725_v50  ;;  %1171 = vmatpush.msra.mxu3 %v725_v50 }
 0x1d1   : > { %1140 = vmatmul.msk.bf16.gmra.mxu1 %vm459_vm0, %v639_v60  ;;  %v601_v61 = vsel %vm459_vm0, %v1624_v36, 0.0 }
 0x1d2   : > { %602 = vadd.xlane.f32.xlu1 %v601_v61  ;;  %759 = vmatpush.msra.mxu2 %v724_v2 }
 0x1d3   : > { %1172 = vmatpush.msra.mxu3 %v724_v2 }
 0x1d4   : > { %v1265_v58 = vpop.eup %1264 }
 0x1d5   : > { %v628_v7 = vmul.f32 %v1265_v58, %v1544_v43 }
 0x215   : > { %v585_v46 = vpop.xlane.xlu1 %584 }
 0x216   : > { %1266 = vrcp.f32 %v585_v46 }
 0x21c   : > { %v1267_v5 = vpop.eup %1266 }
 0x21d   : > { %v629_v8 = vmul.f32 %v1267_v5, %v1553_v63  ;;  %v588_v13 = vpop.xlane.xlu2 %587 }
 0x21e   : > { %v684_v9 = vpop.f32.mrf.mxu1  ;;  %1268 = vrcp.f32 %v588_v13 }
 0x21f   : > { %760 = vmatmul.f32.vlgmr.msra.gmra.mxu2 %v684_v9  ;;  %v640_v12 = vpack.c.bf16 %v629_v8, %v628_v7 }
 0x221   : > { %1141 = vmatmul.msk.bf16.gmra.mxu1 %vm459_vm0, %v640_v12 }
 0x224   : > { %v1269_v17 = vpop.eup %1268 }
 0x225   : > { %v591_v14 = vpop.xlane.xlu0 %590  ;;  %v630_v20 = vmul.f32 %v1269_v17, %v1559_v53 }
 0x226   : > { %1270 = vrcp.f32 %v591_v14  ;;  %v686_v15 = vpop.f32.mrf.mxu1 }
 0x227   : > { %763 = vmatmul.f32.gmra.mxu2 %v686_v15 }
 0x22c   : > { %v1271_v18 = vpop.eup %1270 }
 0x22d   : > { %v631_v21 = vmul.f32 %v1271_v18, %v1566_v3  ;;  %v594_v62 = vpop.xlane.xlu1 %593 }
 0x22e   : > { %v689_v43 = vpop.f32.mrf.mxu1  ;;  %1272 = vrcp.f32 %v594_v62 }
 0x22f   : > { %766 = vmatmul.f32.gmra.mxu2 %v689_v43  ;;  %v641_v63 = vpack.c.bf16 %v631_v21, %v630_v20 }
 0x231   : > { %1142 = vmatmul.msk.bf16.gmra.mxu1 %vm459_vm0, %v641_v63 }
 0x234   : > { %v1273_v23 = vpop.eup %1272 }
 0x235   : > { %v597_v6 = vpop.xlane.xlu2 %596  ;;  %v632_v25 = vmul.f32 %v1273_v23, %v1584_v26 }
 0x236   : > { %1274 = vrcp.f32 %v597_v6  ;;  %v691_v10 = vpop.f32.mrf.mxu1 }
 0x237   : > { %769 = vmatmul.f32.gmra.mxu2 %v691_v10 }
 0x23c   : > { %v1275_v24 = vpop.eup %1274 }
 0x23d   : > { %v633_v28 = vmul.f32 %v1275_v24, %v1603_v44  ;;  %v600_v29 = vpop.xlane.xlu0 %599 }
 0x23e   : > { %v694_v53 = vpop.f32.mrf.mxu1  ;;  %1276 = vrcp.f32 %v600_v29 }
 0x23f   : > { %772 = vmatmul.f32.gmra.mxu2 %v694_v53  ;;  %v642_v3 = vpack.c.bf16 %v633_v28, %v632_v25 }
 0x241   : > { %1143 = vmatmul.msk.bf16.gmra.mxu1 %vm459_vm0, %v642_v3 }
 0x244   : > { %v1277_v32 = vpop.eup %1276 }
 0x245   : > { %v603_v30 = vpop.xlane.xlu1 %602  ;;  %v634_v34 = vmul.f32 %v1277_v32, %v1618_v52 }
 0x246   : > { %1278 = vrcp.f32 %v603_v30  ;;  %v696_v19 = vpop.f32.mrf.mxu1 }
 0x247   : > { %775 = vmatmul.f32.gmra.mxu2 %v696_v19 }
 0x24c   : > { %v1279_v33 = vpop.eup %1278 }
 0x24d   : > { %v635_v37 = vmul.f32 %v1279_v33, %v1624_v36 }
 0x24e   : > { %v699_v26 = vpop.f32.mrf.mxu1 }
 0x24f   : > { %778 = vmatmul.f32.gmra.mxu2 %v699_v26  ;;  %v643_v39 = vpack.c.bf16 %v635_v37, %v634_v34 }
 0x251   : > { %1144 = vmatmul.msk.bf16.gmra.mxu1 %vm459_vm0, %v643_v39 }
 0x256   : > { %v701_v40 = vpop.f32.mrf.mxu1 }
 0x257   : > { %781 = vmatmul.f32.gmra.mxu2 %v701_v40 }
 0x29e   : > { %v704_v41 = vpop.f32.mrf.mxu1 }
 0x29f   : > { %784 = vmatmul.f32.gmra.mxu2 %v704_v41 }
 0x2a2   : > { %v761_v11 = vpop.f32.mrf.mxu2 }
 0x2a3   : > { %v762_v38 = vadd.f32 %v1659_v42, %v761_v11 }
 0x2a5   : > { %1280 = vtanh.f32 %v762_v38 }
 0x2a6   : > { %v706_v44 = vpop.f32.mrf.mxu1 }
 0x2a7   : > { %787 = vmatmul.f32.gmra.mxu2 %v706_v44 }
 0x2aa   : > { %v764_v45 = vpop.f32.mrf.mxu2 }
 0x2ab   : > { %v765_v16 = vadd.f32 %v1659_v42, %v764_v45  ;;  %v1281_v27 = vpop.eup %1280 }
 0x2ac   : > { %v827_v49 = vmul.f32 %v1281_v27, %v1666_v47 }
 0x2ad   : > { %1282 = vtanh.f32 %v765_v16 }
 0x2ae   : > { %v709_v22 = vpop.f32.mrf.mxu1  ;;  %v844_v54 = vsel %vm843_vm2, %v827_v49, 0.0 }
 0x2af   : > { %790 = vmatmul.f32.gmra.mxu2 %v709_v22 }
 0x2b2   : > { %v767_v61 = vpop.f32.mrf.mxu2 }
 0x2b3   : > { %v1283_v51 = vpop.eup %1282  ;;  %v768_v58 = vadd.f32 %v1659_v42, %v767_v61 }
 0x2b4   : > { %v828_v52 = vmul.f32 %v1283_v51, %v1671_v48 }
 0x2b5   : > { %1284 = vtanh.f32 %v768_v58 }
 0x2b6   : > { %v845_v55 = vsel %vm843_vm2, %v828_v52, 0.0  ;;  %v711_v56 = vpop.f32.mrf.mxu1 }
 0x2b7   : > { %v1677_v57 = vadd.f32 %v845_v55, %v844_v54  ;;  %793 = vmatmul.f32.vlgmr.msra.gmra.mxu3 %v711_v56 }
 0x2ba   : > { %v770_v1 = vpop.f32.mrf.mxu2 }
 0x2bb   : > { %v771_v5 = vadd.f32 %v1659_v42, %v770_v1  ;;  %v1285_v21 = vpop.eup %1284 }
 0x2bc   : > { %v829_v30 = vmul.f32 %v1285_v21, %v1666_v47 }
 0x2bd   : > { %1286 = vtanh.f32 %v771_v5 }
 0x2be   : > { %v714_v59 = vpop.f32.mrf.mxu1  ;;  %v853_v44 = vsel %vm843_vm2, %v829_v30, 0.0 }
 0x2bf   : > { %796 = vmatmul.f32.gmra.mxu3 %v714_v59 }
 0x2c2   : > { %v773_v31 = vpop.f32.mrf.mxu2 }
 0x2c3   : > { %v774_v7 = vadd.f32 %v1659_v42, %v773_v31  ;;  %v1287_v63 = vpop.eup %1286 }
 0x2c4   : > { %v830_v28 = vmul.f32 %v1287_v63, %v1671_v48 }
 0x2c5   : > { %1288 = vtanh.f32 %v774_v7 }
 0x2c6   : > { %v716_v0 = vpop.f32.mrf.mxu1  ;;  %v854_v39 = vsel %vm843_vm2, %v830_v28, 0.0 }
 0x2c7   : > { %799 = vmatmul.f32.gmra.mxu3 %v716_v0  ;;  %v855_v27 = vadd.f32 %v854_v39, %v853_v44 }
 0x2c9   : > { %v856_v31 = vrot.slane %v855_v27, 4 }
 0x2ca   : > { %v776_v35 = vpop.f32.mrf.mxu2 }
 0x2cb   : > { %v777_v9 = vadd.f32 %v1659_v42, %v776_v35  ;;  %v1289_v62 = vpop.eup %1288 }
 0x2cc   : > { %v831_v34 = vmul.f32 %v1289_v62, %v1666_v47 }
 0x2cd   : > { %1290 = vtanh.f32 %v777_v9 }
 0x2ce   : > { %v719_v60 = vpop.f32.mrf.mxu1  ;;  %v862_v49 = vsel %vm843_vm2, %v831_v34, 0.0 }
 0x2cf   : > { %802 = vmatmul.f32.gmra.mxu3 %v719_v60 }
 0x2d2   : > { %v779_v50 = vpop.f32.mrf.mxu2 }
 0x2d3   : > { %v780_v12 = vadd.f32 %v1659_v42, %v779_v50  ;;  %v1291_v6 = vpop.eup %1290 }
 0x2d4   : > { %v832_v3 = vmul.f32 %v1291_v6, %v1671_v48 }
 0x2d5   : > { %1292 = vtanh.f32 %v780_v12 }
 0x2d6   : > { %v721_v36 = vpop.f32.mrf.mxu1  ;;  %v863_v11 = vsel %vm843_vm2, %v832_v3, 0.0 }
 0x2d7   : > { %805 = vmatmul.f32.gmra.mxu3 %v721_v36  ;;  %v864_v52 = vadd.f32 %v863_v11, %v862_v49 }
 0x2d9   : > { %v865_v50 = vrot.slane %v864_v52, 4 }
 0x2da   : > { %v782_v2 = vpop.f32.mrf.mxu2 }
 0x2db   : > { %v783_v13 = vadd.f32 %v1659_v42, %v782_v2  ;;  %v1293_v23 = vpop.eup %1292 }
 0x2dc   : > { %v833_v40 = vmul.f32 %v1293_v23, %v1666_v47 }
 0x2dd   : > { %1294 = vtanh.f32 %v783_v13  ;;  %v866_v13 = vadd.f32 %v865_v50, %v864_v52 }
 0x2de   : > { %v871_v54 = vsel %vm843_vm2, %v833_v40, 0.0 }
 0x2df   : > { %v867_v62 = vrot.slane %v866_v13, 2 }
 0x2e1   : > { %v868_v3 = vadd.f32 %v867_v62, %v866_v13 }
 0x2e3   : > { %v1295_v24 = vpop.eup %1294 }
 0x2e4   : > { %v834_v19 = vmul.f32 %v1295_v24, %v1671_v48 }
 0x2e6   : > { %v872_v45 = vsel %vm843_vm2, %v834_v19, 0.0 }
 0x2e7   : > { %v873_v56 = vadd.f32 %v872_v45, %v871_v54 }
 0x322   : > { %v785_v4 = vpop.f32.mrf.mxu2 }
 0x323   : > { %v786_v18 = vadd.f32 %v1659_v42, %v785_v4  ;;  %v874_v4 = vrot.slane %v873_v56, 4 }
 0x32a   : > { %v788_v46 = vpop.f32.mrf.mxu2 }
 0x32b   : > { %v789_v14 = vadd.f32 %v1659_v42, %v788_v46 }
 0x32d   : > { %1296 = vtanh.f32 %v789_v14  ;;  %v847_v14 = vrot.slane %v1677_v57, 4 }
 0x332   : > { %v791_v15 = vpop.f32.mrf.mxu2 }
 0x333   : > { %v792_v20 = vadd.f32 %v1659_v42, %v791_v15  ;;  %v1297_v25 = vpop.eup %1296  ;;  %v875_v15 = vadd.f32 %v874_v4, %v873_v56 }
 0x334   : > { %v836_v37 = vmul.f32 %v1297_v25, %v1671_v48 }
 0x335   : > { %v876_v23 = vrot.slane %v875_v15, 2 }
 0x336   : > { %v881_v51 = vsel %vm843_vm2, %v836_v37, 0.0 }
 0x337   : > { %v877_v19 = vadd.f32 %v876_v23, %v875_v15 }
 0x33a   : > { %v794_v8 = vpop.f32.mrf.mxu3 }
 0x33b   : > { %v795_v17 = vadd.f32 %v1659_v42, %v794_v8  ;;  %v857_v8 = vadd.f32 %v856_v31, %v855_v27 }
 0x33d   : > { %1298 = vtanh.f32 %v795_v17  ;;  %v858_v21 = vrot.slane %v857_v8, 2 }
 0x33e   : > { %1300 = vtanh.f32 %v786_v18 }
 0x33f   : > { %1302 = vtanh.f32 %v792_v20  ;;  %v859_v28 = vadd.f32 %v858_v21, %v857_v8 }
 0x341   : > { %v860_v37 = vrot.slane %v859_v28, 1 }
 0x342   : > { %v797_v43 = vpop.f32.mrf.mxu3 }
 0x343   : > { %v798_v10 = vadd.f32 %v1659_v42, %v797_v43  ;;  %v1299_v53 = vpop.eup %1298  ;;  %v861_v45 = vadd.f32 %v860_v37, %v859_v28 }
 0x344   : > { %v1301_v29 = vpop.eup %1300  ;;  %v838_v41 = vmul.f32 %v1299_v53, %v1671_v48 }
 0x345   : > { %1304 = vtanh.f32 %v798_v10  ;;  %v1303_v33 = vpop.eup %1302  ;;  %v835_v38 = vmul.f32 %v1301_v29, %v1666_v47  ;;  %v848_v10 = vadd.f32 %v847_v14, %v1677_v57 }
 0x346   : > { %v837_v16 = vmul.f32 %v1303_v33, %v1666_v47  ;;  %v890_v55 = vsel %vm843_vm2, %v838_v41, 0.0  ;;  %v878_v41 = vrot.slane %v877_v19, 1 }
 0x347   : > { %v880_v59 = vsel %vm843_vm2, %v835_v38, 0.0  ;;  %v849_v30 = vrot.slane %v848_v10, 2 }
 0x348   : > { %v882_v0 = vadd.f32 %v881_v51, %v880_v59  ;;  %v889_v60 = vsel %vm843_vm2, %v837_v16, 0.0  ;;  %v879_v52 = vadd.f32 %v878_v41, %v877_v19 }
 0x349   : > { %v891_v35 = vadd.f32 %v890_v55, %v889_v60  ;;  %v850_v40 = vadd.f32 %v849_v30, %v848_v10 }
 0x34a   : > { %v800_v32 = vpop.f32.mrf.mxu3  ;;  %v883_v58 = vrot.slane %v882_v0, 4 }
 0x34b   : > { %v801_v26 = vadd.f32 %v1659_v42, %v800_v32  ;;  %v1305_v22 = vpop.eup %1304  ;;  %v892_v9 = vrot.slane %v891_v35, 4 }
 0x34c   : > { %v839_v36 = vmul.f32 %v1305_v22, %v1666_v47  ;;  %v884_v18 = vadd.f32 %v883_v58, %v882_v0 }
 0x34d   : > { %1306 = vtanh.f32 %v801_v26  ;;  %v893_v43 = vadd.f32 %v892_v9, %v891_v35  ;;  %v869_v26 = vrot.slane %v868_v3, 1 }
 0x34e   : > { %v898_v5 = vsel %vm843_vm2, %v839_v36, 0.0  ;;  %v885_v24 = vrot.slane %v884_v18, 2 }
 0x34f   : > { %v894_v53 = vrot.slane %v893_v43, 2  ;;  %v870_v27 = vadd.f32 %v869_v26, %v868_v3 }
 0x350   : > { %v886_v32 = vadd.f32 %v885_v24, %v884_v18 }
 0x352   : > { %v803_v61 = vpop.f32.mrf.mxu3  ;;  %v887_v44 = vrot.slane %v886_v32, 1 }
 0x353   : > { %v1307_v1 = vpop.eup %1306  ;;  %v804_v46 = vadd.f32 %v1659_v42, %v803_v61 }
 0x354   : > { %v840_v2 = vmul.f32 %v1307_v1, %v1671_v48  ;;  %v888_v54 = vadd.f32 %v887_v44, %v886_v32 }
 0x355   : > { %1308 = vtanh.f32 %v804_v46 }
 0x356   : > { %v899_v7 = vsel %vm843_vm2, %v840_v2, 0.0 }
 0x357   : > { %v900_v12 = vadd.f32 %v899_v7, %v898_v5 }
 0x359   : > { %v901_v17 = vrot.slane %v900_v12, 4 }
 0x35a   : > { %v806_v20 = vpop.f32.mrf.mxu3 }
 0x35b   : > { %v807_v63 = vadd.f32 %v1659_v42, %v806_v20  ;;  %v902_v6 = vadd.f32 %v901_v17, %v900_v12  ;;  %v1309_v25 = vpop.eup %1308  ;;  %v895_v42 = vadd.f32 %v894_v53, %v893_v43 }
 0x35c   : > { %v841_v33 = vmul.f32 %v1309_v25, %v1666_v47  ;;  %v851_v47 = vrot.slane %v850_v40, 1 }
 0x35d   : > { %1310 = vtanh.f32 %v807_v63  ;;  %v903_v29 = vrot.slane %v902_v6, 2  ;;  %v896_v22 = vrot.slane %v895_v42, 1 }
 0x35e   : > { %v907_v11 = vsel %vm843_vm2, %v841_v33, 0.0  ;;  %v852_v36 = vadd.f32 %v851_v47, %v850_v40 }
 0x35f   : > { %v904_v57 = vadd.f32 %v903_v29, %v902_v6  ;;  %v897_v55 = vadd.f32 %v896_v22, %v895_v42 }
 0x361   : > { %v905_v49 = vrot.slane %v904_v57, 1 }
 0x363   : > { %v1311_v34 = vpop.eup %1310  ;;  %v906_v0 = vadd.f32 %v905_v49, %v904_v57 }
 0x364   : > { %v842_v39 = vmul.f32 %v1311_v34, %v1671_v48  ;;  %v1215_v48 = vld [vmem:[%s1753_s6] ss:$0 sm:$0xff] }
 0x365   : > { %v921_v59 = vadd.f32 %v1215_v48, %v861_v45  ;;  %v922_v60 = vadd.f32 %v1215_v48, %v870_v27  ;;  %v923_v1 = vadd.f32 %v1215_v48, %v879_v52  ;;  %v924_v31 = vadd.f32 %v1215_v48, %v888_v54 }
 0x366   : > { %v908_v38 = vsel %vm843_vm2, %v842_v39, 0.0  ;;  %v925_v50 = vadd.f32 %v1215_v48, %v897_v55  ;;  %v926_v4 = vadd.f32 %v1215_v48, %v906_v0  ;;  %v920_v5 = vadd.f32 %v1215_v48, %v852_v36 }
 0x367   : > { %v909_v16 = vadd.f32 %v908_v38, %v907_v11  ;;  %v936_v2 = vrot.slane %v921_v59, 7  ;;  %v939_v46 = vrot.slane %v922_v60, 6  ;;  %v942_v7 = vrot.slane %v923_v1, 5 }
 0x368   : > { %v945_v8 = vrot.slane %v924_v31, 4  ;;  %v948_v13 = vrot.slane %v925_v50, 3  ;;  %v951_v15 = vrot.slane %v926_v4, 2 }
 0x369   : > { %v910_v51 = vrot.slane %v909_v16, 4  ;;  %v938_v12 = vsel %vm937_vm3, %v936_v2, %v920_v5 }
 0x36a   : > { %v941_v14 = vsel %vm940_vm4, %v939_v46, %v938_v12 }
 0x36b   : > { %v911_v56 = vadd.f32 %v910_v51, %v909_v16  ;;  %v944_v18 = vsel %vm943_vm5, %v942_v7, %v941_v14 }
 0x36c   : > { %v947_v20 = vsel %vm946_vm6, %v945_v8, %v944_v18 }
 0x36d   : > { %v912_v61 = vrot.slane %v911_v56, 2  ;;  %v950_v21 = vsel %vm949_vm7, %v948_v13, %v947_v20 }
 0x36e   : > { %v953_v63 = vsel %vm952_vm8, %v951_v15, %v950_v21 }
 0x36f   : > { %v913_v35 = vadd.f32 %v912_v61, %v911_v56 }
 0x371   : > { %v914_v58 = vrot.slane %v913_v35, 1 }
 0x373   : > { %v915_v9 = vadd.f32 %v914_v58, %v913_v35 }
 0x375   : > { %v927_v17 = vadd.f32 %v1215_v48, %v915_v9 }
 0x377   : > { %v954_v43 = vrot.slane %v927_v17, 1 }
 0x379   : > { %v956_v62 = vsel %vm955_vm9, %v954_v43, %v953_v63 }
 0x37a   : > { %958 = vxpose.xlu2.b32.start.end [1/1] (short) (narrow) %v956_v62, 8 }
 0x413   : > { %v974_v6 = vpop.trf.xlu2 }
 0x414   : > { %991 = vst.msk [vmem:[%s337_s17] sm:$0x7] %vm990_vm10, %v974_v6 }
 0x415 PF: > { %s17_s28 = sadd.s32 1, %s1350_s28   ;;  %s1755_s24 = smov %s1342_s26 }
 0x416   : > { %p14_p8 = scmp.ge.s32.totalorder %s17_s28, 6   ;;  %s1756_s25 = smov %s1346_s27 }
 0x417   : > { %s1757_s26 = smov %s1760_s29  ;;  %s1758_s27 = smov %s1764_s30 }
 0x418   :  { %16 = sbr.rel (!%p14_p8) target bundleno = 3 (0x3), region = 84 }

</bundles_post_ra>
